<compile_context>
chip_gen: v7x
topology: tpu7x:2x2x1
jax: 0.10.0
libtpu: 0.0.40
codegen_flags: <defaults>
</compile_context>

<pallas_src>
import functools

import jax
import jax.numpy as jnp
from jax import lax
from jax.experimental import pallas as pl
from jax.experimental.pallas import tpu as pltpu

BN_EPS = 1e-5


def _cdiv(a, b):
    return -(-a // b)


def _round_up(a, b):
    return _cdiv(a, b) * b


# --------------------- phase 1: streaming conv + BN partials -------------------
def _conv_stats_kernel(xm_ref, xh_ref, w_ref, b_ref, y_ref, stats_ref, *,
                       kh, kw, stride, th, wo_p, ho, wo, need_mask):
    # xm_ref : (1, TH*stride, Wp, Cin) f32   input rows for this output-row tile
    # xh_ref : (1, HALO,      Wp, Cin) f32   halo rows (start of the next slab)
    # w_ref  : (kh, kw, Cin, Coutp)   bf16   full weight, VMEM resident
    # b_ref  : (1, Coutp)             f32    conv bias
    # y_ref  : (TH*Wo_p, Coutp)       bf16   conv(+bias) output tile
    # stats  : (1, 2, Coutp)          f32    per-tile per-channel [sum, sumsq]
    xb = jnp.concatenate([xm_ref[0], xh_ref[0]], axis=0)  # (TH*stride+HALO, Wp, Cin)
    cin = xb.shape[-1]
    coutp = y_ref.shape[-1]
    wt = w_ref[...]                                       # tiny, lives in vregs

    acc = jnp.zeros((th * wo_p, coutp), jnp.float32)
    for i in range(kh):
        for j in range(kw):
            if stride == 1:
                patch = xb[i:i + th, j:j + wo_p, :]
            else:
                patch = lax.slice(
                    xb, (i, j, 0),
                    (i + (th - 1) * stride + 1, j + (wo_p - 1) * stride + 1, cin),
                    (stride, stride, 1))
            lhs = patch.reshape(th * wo_p, cin).astype(jnp.bfloat16)
            acc = acc + jnp.dot(lhs, wt[i, j], preferred_element_type=jnp.float32)

    acc = acc + b_ref[...]                                # conv bias (f32)

    if need_mask:
        # Zero rows that belong to Ho/Wo padding so they neither pollute the
        # BatchNorm statistics nor the stored activations.
        r = lax.broadcasted_iota(jnp.int32, (th * wo_p, 1), 0)
        ho_idx = pl.program_id(1) * th + r // wo_p
        wo_idx = r % wo_p
        acc = jnp.where((ho_idx < ho) & (wo_idx < wo), acc, 0.0)

    s = jnp.sum(acc, axis=0, keepdims=True)               # (1, Coutp)
    ss = jnp.sum(acc * acc, axis=0, keepdims=True)        # (1, Coutp)
    stats_ref[...] = jnp.concatenate([s, ss], axis=0)[None]
    y_ref[...] = acc.astype(y_ref.dtype)


# --------------------- phase 2: fused BN affine + ReLU --------------------------
def _bn_relu_kernel(y_ref, scale_ref, shift_ref, o_ref):
    y = y_ref[...].astype(jnp.float32)
    o_ref[...] = jnp.maximum(y * scale_ref[...] + shift_ref[...], 0.0)


def conv_bn_relu(x, weight, bias, gamma, beta, stride=1, padding=1):
    """x: (N, Cin, H, W) f32; weight: (Cout, Cin, kh, kw). Returns NCHW f32.

    BatchNorm uses train-mode batch statistics (nn.BatchNorm2d default while
    training).  TODO(synk): eval-mode BN (running_mean/running_var) would need
    the statistics passed in instead of computed from the batch.
    """
    N, Cin, H, W = x.shape
    Cout, _, kh, kw = weight.shape

    Ho = (H + 2 * padding - kh) // stride + 1
    Wo = (W + 2 * padding - kw) // stride + 1

    # ---- tiling (lane-dense Coutp, sublane-aligned Wo, halo-aligned TH) ----
    Coutp = _round_up(Cout, 128)
    halo = max(8, _round_up(max(kh - 1, 1), 8))
    Wo_p = _round_up(Wo, 8)
    th = _round_up(max(_cdiv(512, Wo_p), 1), halo)        # ~512 flat rows per tile
    th = min(th, _round_up(Ho, halo))
    # keep the streamed input slab + y tile + f32 accumulator well inside VMEM
    while th > halo and (th * stride * ((Wo_p - 1) * stride + kw) * Cin * 4
                         + th * Wo_p * Coutp * 6) > (6 << 20):
        th -= halo
    n_h = _cdiv(Ho, th)
    Ho_p = n_h * th
    th_in = th * stride
    Hp = (n_h + 1) * th_in                                # one spare slab for the halo
    Wp = (Wo_p - 1) * stride + kw
    base = th * Wo_p                                      # flat output rows per tile
    n_blk = N * n_h
    need_mask = (Wo_p != Wo) or (Ho_p != Ho)

    # ---- glue: pad once to (N, Hp, Wp, Cin); NO im2col materialization ----
    x_nhwc = jnp.transpose(x, (0, 2, 3, 1)).astype(jnp.float32)
    x_pad = jnp.pad(x_nhwc, ((0, 0),
                             (padding, max(0, Hp - H - padding)),
                             (padding, max(0, Wp - W - padding)),
                             (0, 0)))[:, :Hp, :Wp, :]
    # weight (Cout, Cin, kh, kw) -> (kh, kw, Cin, Coutp) bf16, bias -> (1, Coutp)
    w4 = jnp.transpose(weight, (2, 3, 1, 0)).astype(jnp.float32)
    w4 = jnp.pad(w4, ((0, 0), (0, 0), (0, 0), (0, Coutp - Cout))).astype(jnp.bfloat16)
    b2 = jnp.pad(bias.astype(jnp.float32), (0, Coutp - Cout)).reshape(1, Coutp)

    kernel1 = functools.partial(_conv_stats_kernel, kh=kh, kw=kw, stride=stride,
                                th=th, wo_p=Wo_p, ho=Ho, wo=Wo, need_mask=need_mask)

    # VMEM limit derived from the actual footprint (double-buffered slabs/outputs
    # + resident weight + f32 accumulator) with headroom -- not a blanket 48 MiB.
    fp1 = (2 * th_in * Wp * Cin * 4 + 2 * halo * Wp * Cin * 4
           + kh * kw * Cin * Coutp * 2 + Coutp * 4
           + 2 * base * Coutp * 2 + 2 * 2 * Coutp * 4
           + base * Coutp * 4 + 2 * th_in * Wp * Cin * 4)
    vmem1 = min(int(1.5 * fp1) + (4 << 20), 48 << 20)

    y_flat, stats = pl.pallas_call(
        kernel1,
        out_shape=(jax.ShapeDtypeStruct((n_blk * base, Coutp), jnp.bfloat16),
                   jax.ShapeDtypeStruct((n_blk, 2, Coutp), jnp.float32)),
        grid_spec=pltpu.PrefetchScalarGridSpec(
            num_scalar_prefetch=0,
            grid=(N, n_h),
            in_specs=[
                # streamed input slab for this output-row tile
                pl.BlockSpec((1, th_in, Wp, Cin), lambda n, h: (n, h, 0, 0)),
                # halo: first `halo` rows of the next slab
                pl.BlockSpec((1, halo, Wp, Cin),
                             lambda n, h: (n, (h + 1) * (th_in // halo), 0, 0)),
                # full weight / bias with constant block index => fetched once
                pl.BlockSpec((kh, kw, Cin, Coutp), lambda n, h: (0, 0, 0, 0)),
                pl.BlockSpec((1, Coutp), lambda n, h: (0, 0)),
            ],
            out_specs=[
                pl.BlockSpec((base, Coutp), lambda n, h: (n * n_h + h, 0)),
                pl.BlockSpec((1, 2, Coutp), lambda n, h: (n * n_h + h, 0, 0)),
            ]),
        compiler_params=pltpu.CompilerParams(
            dimension_semantics=("parallel", "parallel"),
            vmem_limit_bytes=vmem1),
    )(x_pad, x_pad, w4, b2)

    # ---- global BN statistics from the tiny (n_blk, 2, Coutp) partials ----
    # Padded output rows/cols were masked to zero in the kernel; divide by valid M.
    count = N * Ho * Wo
    ch_sum = jnp.sum(stats[:, 0, :], axis=0)
    ch_sumsq = jnp.sum(stats[:, 1, :], axis=0)
    mean = ch_sum / count
    # TODO(synk): E[y^2]-E[y]^2 can cancel when |mean| >> std; switch to per-tile
    # shifted sums + Chan's combination if BN accuracy ever becomes an issue.
    var = jnp.maximum(ch_sumsq / count - mean * mean, 0.0)
    inv = lax.rsqrt(var + BN_EPS)
    gamma_p = jnp.pad(gamma.astype(jnp.float32), (0, Coutp - Cout))
    beta_p = jnp.pad(beta.astype(jnp.float32), (0, Coutp - Cout))
    # Padded channels: var=0 -> inv=rsqrt(eps), but gamma_p=0 keeps scale/shift 0.
    scale = (gamma_p * inv).reshape(1, Coutp)
    shift = (beta_p - gamma_p * inv * mean).reshape(1, Coutp)

    # ---- phase 2: large flat tiles, decoupled from the phase-1 tiling ----
    cap_g = max(1, 4096 // base)
    g = 1
    for cand in range(min(n_blk, cap_g), 0, -1):
        if n_blk % cand == 0:
            g = cand
            break
    tm2 = g * base
    vmem2 = min(int(1.5 * (2 * tm2 * Coutp * 2 + 2 * tm2 * Coutp * 4
                           + 4 * Coutp * 4)) + (2 << 20), 48 << 20)

    out_flat = pl.pallas_call(
        _bn_relu_kernel,
        out_shape=jax.ShapeDtypeStruct((n_blk * base, Coutp), jnp.float32),
        grid_spec=pltpu.PrefetchScalarGridSpec(
            num_scalar_prefetch=0,
            grid=(n_blk * base // tm2,),
            in_specs=[pl.BlockSpec((tm2, Coutp), lambda m: (m, 0)),
                      pl.BlockSpec((1, Coutp), lambda m: (0, 0)),
                      pl.BlockSpec((1, Coutp), lambda m: (0, 0))],
            out_specs=pl.BlockSpec((tm2, Coutp), lambda m: (m, 0))),
        compiler_params=pltpu.CompilerParams(
            dimension_semantics=("parallel",),
            vmem_limit_bytes=vmem2),
    )(y_flat, scale, shift)

    out = out_flat.reshape(N, Ho_p, Wo_p, Coutp)[:, :Ho, :Wo, :Cout]
    # TODO(synk): return NHWC directly if the consumer allows, skipping this pass.
    return jnp.transpose(out, (0, 3, 1, 2))


def _reference(x, weight, bias, gamma, beta, stride=1, padding=1):
    y = lax.conv_general_dilated(
        x, weight, window_strides=(stride, stride),
        padding=[(padding, padding), (padding, padding)],
        dimension_numbers=("NCHW", "OIHW", "NCHW"))
    y = y + bias.reshape(1, -1, 1, 1)
    mean = jnp.mean(y, axis=(0, 2, 3), keepdims=True)
    var = jnp.mean((y - mean) ** 2, axis=(0, 2, 3), keepdims=True)
    # Mirror the kernel's bf16 inter-pass buffer (stats stay f32, like the kernel).
    y_q = y.astype(jnp.bfloat16).astype(jnp.float32)
    y_n = (y_q - mean) * lax.rsqrt(var + BN_EPS)
    out = gamma.reshape(1, -1, 1, 1) * y_n + beta.reshape(1, -1, 1, 1)
    return jnp.maximum(out, 0.0)


if __name__ == "__main__":
    key = jax.random.PRNGKey(0)
    k_x, k_w, k_b = jax.random.split(key, 3)

    N, Cin, H, W = 2, 4, 16, 16
    Cout, kh, kw = 8, 3, 3
    stride, padding = 1, 1

    x = jax.random.normal(k_x, (N, Cin, H, W), dtype=jnp.float32)
    weight = jax.random.normal(k_w, (Cout, Cin, kh, kw), dtype=jnp.float32) * 0.1
    bias = jax.random.normal(k_b, (Cout,), dtype=jnp.float32) * 0.1
    gamma = jnp.ones((Cout,), dtype=jnp.float32)   # BatchNorm2d default weight
    beta = jnp.zeros((Cout,), dtype=jnp.float32)   # BatchNorm2d default bias

    out = conv_bn_relu(x, weight, bias, gamma, beta, stride=stride, padding=padding)
    out = jax.block_until_ready(out)

    # Fair reference: bf16-rounded conv inputs (the kernel feeds the MXU bf16),
    # f32 conv accumulation and f32 BN statistics, conv output rounded to bf16
    # before the BN affine (mirroring the kernel's bf16 inter-pass buffer).
    x_bf = x.astype(jnp.bfloat16).astype(jnp.float32)
    w_bf = weight.astype(jnp.bfloat16).astype(jnp.float32)
    ref = jax.block_until_ready(
        _reference(x_bf, w_bf, bias, gamma, beta, stride=stride, padding=padding))

    assert out.shape == (N, Cout, H, W)
    err = jnp.abs(out - ref)
    # Max bound covers a possible 1-ulp bf16 tie-flip of y scaled by gamma/std;
    # mean bound verifies there is no systematic error.
    assert float(jnp.max(err)) < 5e-2, f"max err {float(jnp.max(err))}"
    assert float(jnp.mean(err)) < 1e-3, f"mean err {float(jnp.mean(err))}"

    print("KERNEL_OK")
</pallas_src>

<mosaic_0001>
module attributes {stable_mosaic.version = 11 : i64} {
  func.func @_conv_stats_kernel(%arg0: i32, %arg1: i32, %arg2: memref<1x16x18x4xf32, #tpu.memory_space<vmem>>, %arg3: memref<1x8x18x4xf32, #tpu.memory_space<vmem>>, %arg4: memref<3x3x4x128xbf16, #tpu.memory_space<vmem>>, %arg5: memref<1x128xf32, #tpu.memory_space<vmem>>, %arg6: memref<256x128xbf16, #tpu.memory_space<vmem>>, %arg7: memref<1x2x128xf32, #tpu.memory_space<vmem>>) attributes {dimension_semantics = [#tpu.dimension_semantics<parallel>, #tpu.dimension_semantics<parallel>], iteration_bounds = array<i64: 2, 1>, scalar_prefetch = 0 : i64, scratch_operands = 0 : i64, tpu.core_type = #tpu.core_type<tc>, window_params = [{transform_indices = @transform_0, window_bounds = array<i64: 1, 16, 18, 4>}, {transform_indices = @transform_1, window_bounds = array<i64: 1, 8, 18, 4>}, {pipeline_mode = #tpu.pipeline_mode<synchronous>, transform_indices = @transform_2, window_bounds = array<i64: 3, 3, 4, 128>}, {pipeline_mode = #tpu.pipeline_mode<synchronous>, transform_indices = @transform_3, window_bounds = array<i64: 1, 128>}, {transform_indices = @transform_4, window_bounds = array<i64: 256, 128>}, {transform_indices = @transform_5, window_bounds = array<i64: 1, 2, 128>}]} {
    %c0 = arith.constant 0 : index
    %c0_0 = arith.constant 0 : index
    %c0_1 = arith.constant 0 : index
    %c0_2 = arith.constant 0 : index
    %0 = vector.load %arg2[%c0, %c0_0, %c0_1, %c0_2] : memref<1x16x18x4xf32, #tpu.memory_space<vmem>>, vector<1x16x18x4xf32>
    %1 = vector.shape_cast %0 : vector<1x16x18x4xf32> to vector<16x18x4xf32>
    %c0_3 = arith.constant 0 : index
    %c0_4 = arith.constant 0 : index
    %c0_5 = arith.constant 0 : index
    %c0_6 = arith.constant 0 : index
    %2 = vector.load %arg3[%c0_3, %c0_4, %c0_5, %c0_6] : memref<1x8x18x4xf32, #tpu.memory_space<vmem>>, vector<1x8x18x4xf32>
    %3 = vector.shape_cast %2 : vector<1x8x18x4xf32> to vector<8x18x4xf32>
    %4 = tpu.concatenate %1, %3 in 0 : vector<16x18x4xf32>, vector<8x18x4xf32> -> vector<24x18x4xf32>
    %c0_7 = arith.constant 0 : index
    %c0_8 = arith.constant 0 : index
    %c0_9 = arith.constant 0 : index
    %c0_10 = arith.constant 0 : index
    %5 = vector.load %arg4[%c0_7, %c0_8, %c0_9, %c0_10] : memref<3x3x4x128xbf16, #tpu.memory_space<vmem>>, vector<3x3x4x128xbf16>
    %cst = arith.constant 0.000000e+00 : f32
    %6 = vector.broadcast %cst : f32 to vector<256x128xf32>
    %7 = vector.extract_strided_slice %4 {offsets = [0, 0, 0], sizes = [16, 16, 4], strides = [1, 1, 1]} : vector<24x18x4xf32> to vector<16x16x4xf32>
    %8 = vector.shape_cast %7 : vector<16x16x4xf32> to vector<256x4xf32>
    %9 = arith.truncf %8 : vector<256x4xf32> to vector<256x4xbf16>
    %10 = vector.extract_strided_slice %5 {offsets = [0, 0, 0, 0], sizes = [1, 1, 4, 128], strides = [1, 1, 1, 1]} : vector<3x3x4x128xbf16> to vector<1x1x4x128xbf16>
    %11 = vector.shape_cast %10 : vector<1x1x4x128xbf16> to vector<4x128xbf16>
    %cst_11 = arith.constant dense<0.000000e+00> : vector<256x128xf32>
    %12 = tpu.matmul %9, %11, %cst_11 {dimension_numbers = #tpu.dot_dimension_numbers<[1], [0], [0], [1], [0, 0, 1, 1], [], []>} : vector<256x4xbf16>, vector<4x128xbf16>, vector<256x128xf32> -> vector<256x128xf32>
    %13 = arith.addf %6, %12 : vector<256x128xf32>
    %14 = vector.extract_strided_slice %4 {offsets = [0, 1, 0], sizes = [16, 16, 4], strides = [1, 1, 1]} : vector<24x18x4xf32> to vector<16x16x4xf32>
    %15 = vector.shape_cast %14 : vector<16x16x4xf32> to vector<256x4xf32>
    %16 = arith.truncf %15 : vector<256x4xf32> to vector<256x4xbf16>
    %17 = vector.extract_strided_slice %5 {offsets = [0, 1, 0, 0], sizes = [1, 1, 4, 128], strides = [1, 1, 1, 1]} : vector<3x3x4x128xbf16> to vector<1x1x4x128xbf16>
    %18 = vector.shape_cast %17 : vector<1x1x4x128xbf16> to vector<4x128xbf16>
    %cst_12 = arith.constant dense<0.000000e+00> : vector<256x128xf32>
    %19 = tpu.matmul %16, %18, %cst_12 {dimension_numbers = #tpu.dot_dimension_numbers<[1], [0], [0], [1], [0, 0, 1, 1], [], []>} : vector<256x4xbf16>, vector<4x128xbf16>, vector<256x128xf32> -> vector<256x128xf32>
    %20 = arith.addf %13, %19 : vector<256x128xf32>
    %21 = vector.extract_strided_slice %4 {offsets = [0, 2, 0], sizes = [16, 16, 4], strides = [1, 1, 1]} : vector<24x18x4xf32> to vector<16x16x4xf32>
    %22 = vector.shape_cast %21 : vector<16x16x4xf32> to vector<256x4xf32>
    %23 = arith.truncf %22 : vector<256x4xf32> to vector<256x4xbf16>
    %24 = vector.extract_strided_slice %5 {offsets = [0, 2, 0, 0], sizes = [1, 1, 4, 128], strides = [1, 1, 1, 1]} : vector<3x3x4x128xbf16> to vector<1x1x4x128xbf16>
    %25 = vector.shape_cast %24 : vector<1x1x4x128xbf16> to vector<4x128xbf16>
    %cst_13 = arith.constant dense<0.000000e+00> : vector<256x128xf32>
    %26 = tpu.matmul %23, %25, %cst_13 {dimension_numbers = #tpu.dot_dimension_numbers<[1], [0], [0], [1], [0, 0, 1, 1], [], []>} : vector<256x4xbf16>, vector<4x128xbf16>, vector<256x128xf32> -> vector<256x128xf32>
    %27 = arith.addf %20, %26 : vector<256x128xf32>
    %28 = vector.extract_strided_slice %4 {offsets = [1, 0, 0], sizes = [16, 16, 4], strides = [1, 1, 1]} : vector<24x18x4xf32> to vector<16x16x4xf32>
    %29 = vector.shape_cast %28 : vector<16x16x4xf32> to vector<256x4xf32>
    %30 = arith.truncf %29 : vector<256x4xf32> to vector<256x4xbf16>
    %31 = vector.extract_strided_slice %5 {offsets = [1, 0, 0, 0], sizes = [1, 1, 4, 128], strides = [1, 1, 1, 1]} : vector<3x3x4x128xbf16> to vector<1x1x4x128xbf16>
    %32 = vector.shape_cast %31 : vector<1x1x4x128xbf16> to vector<4x128xbf16>
    %cst_14 = arith.constant dense<0.000000e+00> : vector<256x128xf32>
    %33 = tpu.matmul %30, %32, %cst_14 {dimension_numbers = #tpu.dot_dimension_numbers<[1], [0], [0], [1], [0, 0, 1, 1], [], []>} : vector<256x4xbf16>, vector<4x128xbf16>, vector<256x128xf32> -> vector<256x128xf32>
    %34 = arith.addf %27, %33 : vector<256x128xf32>
    %35 = vector.extract_strided_slice %4 {offsets = [1, 1, 0], sizes = [16, 16, 4], strides = [1, 1, 1]} : vector<24x18x4xf32> to vector<16x16x4xf32>
    %36 = vector.shape_cast %35 : vector<16x16x4xf32> to vector<256x4xf32>
    %37 = arith.truncf %36 : vector<256x4xf32> to vector<256x4xbf16>
    %38 = vector.extract_strided_slice %5 {offsets = [1, 1, 0, 0], sizes = [1, 1, 4, 128], strides = [1, 1, 1, 1]} : vector<3x3x4x128xbf16> to vector<1x1x4x128xbf16>
    %39 = vector.shape_cast %38 : vector<1x1x4x128xbf16> to vector<4x128xbf16>
    %cst_15 = arith.constant dense<0.000000e+00> : vector<256x128xf32>
    %40 = tpu.matmul %37, %39, %cst_15 {dimension_numbers = #tpu.dot_dimension_numbers<[1], [0], [0], [1], [0, 0, 1, 1], [], []>} : vector<256x4xbf16>, vector<4x128xbf16>, vector<256x128xf32> -> vector<256x128xf32>
    %41 = arith.addf %34, %40 : vector<256x128xf32>
    %42 = vector.extract_strided_slice %4 {offsets = [1, 2, 0], sizes = [16, 16, 4], strides = [1, 1, 1]} : vector<24x18x4xf32> to vector<16x16x4xf32>
    %43 = vector.shape_cast %42 : vector<16x16x4xf32> to vector<256x4xf32>
    %44 = arith.truncf %43 : vector<256x4xf32> to vector<256x4xbf16>
    %45 = vector.extract_strided_slice %5 {offsets = [1, 2, 0, 0], sizes = [1, 1, 4, 128], strides = [1, 1, 1, 1]} : vector<3x3x4x128xbf16> to vector<1x1x4x128xbf16>
    %46 = vector.shape_cast %45 : vector<1x1x4x128xbf16> to vector<4x128xbf16>
    %cst_16 = arith.constant dense<0.000000e+00> : vector<256x128xf32>
    %47 = tpu.matmul %44, %46, %cst_16 {dimension_numbers = #tpu.dot_dimension_numbers<[1], [0], [0], [1], [0, 0, 1, 1], [], []>} : vector<256x4xbf16>, vector<4x128xbf16>, vector<256x128xf32> -> vector<256x128xf32>
    %48 = arith.addf %41, %47 : vector<256x128xf32>
    %49 = vector.extract_strided_slice %4 {offsets = [2, 0, 0], sizes = [16, 16, 4], strides = [1, 1, 1]} : vector<24x18x4xf32> to vector<16x16x4xf32>
    %50 = vector.shape_cast %49 : vector<16x16x4xf32> to vector<256x4xf32>
    %51 = arith.truncf %50 : vector<256x4xf32> to vector<256x4xbf16>
    %52 = vector.extract_strided_slice %5 {offsets = [2, 0, 0, 0], sizes = [1, 1, 4, 128], strides = [1, 1, 1, 1]} : vector<3x3x4x128xbf16> to vector<1x1x4x128xbf16>
    %53 = vector.shape_cast %52 : vector<1x1x4x128xbf16> to vector<4x128xbf16>
    %cst_17 = arith.constant dense<0.000000e+00> : vector<256x128xf32>
    %54 = tpu.matmul %51, %53, %cst_17 {dimension_numbers = #tpu.dot_dimension_numbers<[1], [0], [0], [1], [0, 0, 1, 1], [], []>} : vector<256x4xbf16>, vector<4x128xbf16>, vector<256x128xf32> -> vector<256x128xf32>
    %55 = arith.addf %48, %54 : vector<256x128xf32>
    %56 = vector.extract_strided_slice %4 {offsets = [2, 1, 0], sizes = [16, 16, 4], strides = [1, 1, 1]} : vector<24x18x4xf32> to vector<16x16x4xf32>
    %57 = vector.shape_cast %56 : vector<16x16x4xf32> to vector<256x4xf32>
    %58 = arith.truncf %57 : vector<256x4xf32> to vector<256x4xbf16>
    %59 = vector.extract_strided_slice %5 {offsets = [2, 1, 0, 0], sizes = [1, 1, 4, 128], strides = [1, 1, 1, 1]} : vector<3x3x4x128xbf16> to vector<1x1x4x128xbf16>
    %60 = vector.shape_cast %59 : vector<1x1x4x128xbf16> to vector<4x128xbf16>
    %cst_18 = arith.constant dense<0.000000e+00> : vector<256x128xf32>
    %61 = tpu.matmul %58, %60, %cst_18 {dimension_numbers = #tpu.dot_dimension_numbers<[1], [0], [0], [1], [0, 0, 1, 1], [], []>} : vector<256x4xbf16>, vector<4x128xbf16>, vector<256x128xf32> -> vector<256x128xf32>
    %62 = arith.addf %55, %61 : vector<256x128xf32>
    %63 = vector.extract_strided_slice %4 {offsets = [2, 2, 0], sizes = [16, 16, 4], strides = [1, 1, 1]} : vector<24x18x4xf32> to vector<16x16x4xf32>
    %64 = vector.shape_cast %63 : vector<16x16x4xf32> to vector<256x4xf32>
    %65 = arith.truncf %64 : vector<256x4xf32> to vector<256x4xbf16>
    %66 = vector.extract_strided_slice %5 {offsets = [2, 2, 0, 0], sizes = [1, 1, 4, 128], strides = [1, 1, 1, 1]} : vector<3x3x4x128xbf16> to vector<1x1x4x128xbf16>
    %67 = vector.shape_cast %66 : vector<1x1x4x128xbf16> to vector<4x128xbf16>
    %cst_19 = arith.constant dense<0.000000e+00> : vector<256x128xf32>
    %68 = tpu.matmul %65, %67, %cst_19 {dimension_numbers = #tpu.dot_dimension_numbers<[1], [0], [0], [1], [0, 0, 1, 1], [], []>} : vector<256x4xbf16>, vector<4x128xbf16>, vector<256x128xf32> -> vector<256x128xf32>
    %69 = arith.addf %62, %68 : vector<256x128xf32>
    %c0_20 = arith.constant 0 : index
    %c0_21 = arith.constant 0 : index
    %70 = vector.load %arg5[%c0_20, %c0_21] : memref<1x128xf32, #tpu.memory_space<vmem>>, vector<1x128xf32>
    %71 = vector.broadcast %70 : vector<1x128xf32> to vector<256x128xf32>
    %72 = arith.addf %69, %71 : vector<256x128xf32>
    %cst_22 = arith.constant dense<0.000000e+00> : vector<128xf32>
    %73 = vector.multi_reduction <add>, %72, %cst_22 [0] : vector<256x128xf32> to vector<128xf32>
    %74 = vector.shape_cast %73 : vector<128xf32> to vector<1x128xf32>
    %75 = arith.mulf %72, %72 : vector<256x128xf32>
    %cst_23 = arith.constant dense<0.000000e+00> : vector<128xf32>
    %76 = vector.multi_reduction <add>, %75, %cst_23 [0] : vector<256x128xf32> to vector<128xf32>
    %77 = vector.shape_cast %76 : vector<128xf32> to vector<1x128xf32>
    %78 = tpu.concatenate %74, %77 in 0 : vector<1x128xf32>, vector<1x128xf32> -> vector<2x128xf32>
    %79 = vector.shape_cast %78 : vector<2x128xf32> to vector<1x2x128xf32>
    %c0_24 = arith.constant 0 : index
    %c0_25 = arith.constant 0 : index
    %c0_26 = arith.constant 0 : index
    %80 = vector.load %arg7[%c0_24, %c0_25, %c0_26] : memref<1x2x128xf32, #tpu.memory_space<vmem>>, vector<1x2x128xf32>
    tpu.vector_store %arg7[%c0_24, %c0_25, %c0_26], %79 {strides = array<i32>} : memref<1x2x128xf32, #tpu.memory_space<vmem>>, vector<1x2x128xf32>,
    %81 = arith.truncf %72 : vector<256x128xf32> to vector<256x128xbf16>
    %c0_27 = arith.constant 0 : index
    %c0_28 = arith.constant 0 : index
    %82 = vector.load %arg6[%c0_27, %c0_28] : memref<256x128xbf16, #tpu.memory_space<vmem>>, vector<256x128xbf16>
    tpu.vector_store %arg6[%c0_27, %c0_28], %81 {strides = array<i32>} : memref<256x128xbf16, #tpu.memory_space<vmem>>, vector<256x128xbf16>,
    return
  }
  func.func @transform_0(%arg0: i32, %arg1: i32) -> (i32, i32, i32, i32) {
    %c0_i32 = arith.constant 0 : i32
    %c0_i32_0 = arith.constant 0 : i32
    %c0_i32_1 = arith.constant 0 : i32
    return %arg0, %arg1, %c0_i32, %c0_i32_0 : i32, i32, i32, i32
  }
  func.func @transform_1(%arg0: i32, %arg1: i32) -> (i32, i32, i32, i32) {
    %c1_i32 = arith.constant 1 : i32
    %0 = arith.addi %arg1, %c1_i32 : i32
    %c2_i32 = arith.constant 2 : i32
    %1 = arith.muli %0, %c2_i32 : i32
    %c0_i32 = arith.constant 0 : i32
    %c0_i32_0 = arith.constant 0 : i32
    %c0_i32_1 = arith.constant 0 : i32
    return %arg0, %1, %c0_i32, %c0_i32_0 : i32, i32, i32, i32
  }
  func.func @transform_2(%arg0: i32, %arg1: i32) -> (i32, i32, i32, i32) {
    %c0_i32 = arith.constant 0 : i32
    %c0_i32_0 = arith.constant 0 : i32
    %c0_i32_1 = arith.constant 0 : i32
    %c0_i32_2 = arith.constant 0 : i32
    %c0_i32_3 = arith.constant 0 : i32
    return %c0_i32, %c0_i32_0, %c0_i32_1, %c0_i32_2 : i32, i32, i32, i32
  }
  func.func @transform_3(%arg0: i32, %arg1: i32) -> (i32, i32) {
    %c0_i32 = arith.constant 0 : i32
    %c0_i32_0 = arith.constant 0 : i32
    %c0_i32_1 = arith.constant 0 : i32
    return %c0_i32, %c0_i32_0 : i32, i32
  }
  func.func @transform_4(%arg0: i32, %arg1: i32) -> (i32, i32) {
    %c1_i32 = arith.constant 1 : i32
    %0 = arith.muli %arg0, %c1_i32 : i32
    %1 = arith.addi %0, %arg1 : i32
    %c0_i32 = arith.constant 0 : i32
    %c0_i32_0 = arith.constant 0 : i32
    return %1, %c0_i32 : i32, i32
  }
  func.func @transform_5(%arg0: i32, %arg1: i32) -> (i32, i32, i32) {
    %c1_i32 = arith.constant 1 : i32
    %0 = arith.muli %arg0, %c1_i32 : i32
    %1 = arith.addi %0, %arg1 : i32
    %c0_i32 = arith.constant 0 : i32
    %c0_i32_0 = arith.constant 0 : i32
    %c0_i32_1 = arith.constant 0 : i32
    return %1, %c0_i32, %c0_i32_0 : i32, i32, i32
  }
}

</mosaic_0001>

<bundles_post_ra>
// kernel: tpu_custom_call.1
= control target key start
LH: loop header
LB: loop body
LE: loop exit
PB: predicated region body
PF: predicated region fallthrough
CT: control target
= control target key end

     0   :  { %11 = vsyncpa [#allocation3], 0  ;;  %s5405_s0 = inlined_call_operand.vmem [shape: f32[2,32,18,4], index: 0, kind: input, shape index: {}]   ;;  %s5406_s1 = inlined_call_operand.vmem [shape: f32[2,32,18,4], index: 1, kind: input, shape index: {}]   ;;  %s5407_s2 = inlined_call_operand.vmem [shape: bf16[3,3,4,128], index: 2, kind: input, shape index: {}]   ;;  %s5408_s3 = inlined_call_operand.vmem [shape: f32[1,128], index: 3, kind: input, shape index: {}]   ;;  %s5409_s4 = inlined_call_operand.hbm [shape: bf16[512,128], index: 4, kind: output, shape index: {0}]   ;;  %s5410_s5 = inlined_call_operand.hbm [shape: f32[2,2,128], index: 5, kind: output, shape index: {1}]  }
   0x1   :  { %13 = vsyncpa [#allocation3 + $0x1], 0 }
   0x2   :  { %14 = vsyncpa [#allocation5], 0 }
   0x3   :  { %16 = vsyncpa [#allocation5 + $0x1], 0  ;;  %s4352_s18 = smov 0   ;;  %s4354_s19 = smov 0  }
   0x4   :  { %s4356_s20 = smov 0   ;;  %s4358_s21 = smov 0  }
   0x5   :  { %s4360_s22 = smov 0   ;;  %s4362_s23 = smov 0  }
   0x6 LB: > { %s3091_s24 = sadd.s32 4294967295, %s4316_s23   ;;  %s3092_s25 = sadd.s32 4294967294, %s4316_s23   ;;  %s4316_s23 = sphi %s4362_s23, %s22_s23   ;;  %s4312_s22 = sphi %s4360_s22, %s5476_s22   ;;  %s4308_s21 = sphi %s4358_s21, %s5475_s21   ;;  %s4304_s20 = sphi %s4356_s20, %s5474_s20   ;;  %s4300_s19 = sphi %s4354_s19, %s5473_s19   ;;  %s4296_s18 = sphi %s4352_s18, %s5472_s18  }
   0x7   : > { %s34_s26 = sadd.s32 1, %s4312_s22  ;;  %s145_s27 = sadd.s32 1, %s4304_s20 }
   0x8   : > { %p36_p0 = scmp.ge.s32.totalorder %s34_s26, 2  ;;  %p155_p1 = scmp.ne.s32.totalorder %s4304_s20, %s4300_s19 }
   0x9   : > { %p156_p2 = scmp.eq.s32.totalorder %s3091_s24, 1  ;;  %p161_p3 = scmp.ne.s32.totalorder %s4300_s19, %s4296_s18 }
   0xa   : > { %s5478_s26 = smov (%p36_p0, %s34_s26), 0  ;;  %p162_p5 = scmp.eq.s32.totalorder %s3092_s25, 1 }
   0xb   : > { %p4392_p4 = por %p156_p2, %p155_p1  ;;  %s142_s29 = ssub.s32 %s4312_s22, %s5478_s26 }
   0xc   : > { %p3095_p6 = scmp.ge.s32.totalorder %s4316_s23, 1  ;;  %p143_p7 = scmp.eq.s32.totalorder %s142_s29, 0 }
   0xd   : > { %p4399_p8 = por %p162_p5, %p161_p3  ;;  %p246_p9 = scmp.lt.s32.totalorder %s4316_s23, 3 }
   0xe   : > { %s4405_s6 = scalar_select %p143_p7, %s4304_s20, %s145_s27  }
   0xf   : > { %p247_p10 = pnand %p3095_p6, %p246_p9 }
  0x11   : > { %250 = sbr.rel (%p247_p10) target bundleno = 586 (0x24a), region = 36 }
  0x18   : > { %v381_v0 = vld [vmem:[%s5407_s2 + $0x2] sm:$0x3]  ;;  %vm631_vm0 = vcmask 1041408   ;;  %v4413_v1 = vld [vmem:[%s5407_s2 + $0x8] sm:$0x3]  ;;  %p297_p11 = scmp.lt.s32.totalorder %s4308_s21, 1 }
  0x19   : > { %5438 = vst [vmem:[#allocation8_spill] sm:$0xff] %v4413_v1  ;;  %4131 = vmatprep.subr.msk.bf16.mxu1 %vm631_vm0, %v381_v0  ;;  %4135 = vmatprep.subr.msk.bf16.mxu0 %vm631_vm0, %v4413_v1  ;;  %v633_v2 = vsel %vm631_vm0, %v381_v0, 0  ;;  %v4422_v3 = vsel %vm631_vm0, %v4413_v1, 0  ;;  %v380_v4 = vld [vmem:[%s5407_s2] sm:$0x3]  ;;  %vm453_vm1 = vcmask 1046528  }
  0x1a   : > { %5439 = vst [vmem:[#allocation9_spill] sm:$0xff] %v4422_v3  ;;  %3568 = vmatpush3.bf16.msra.mxu1 %v633_v2  ;;  %3704 = vmatpush3.bf16.msra.mxu0 %v4422_v3  ;;  %s4429_s13 = scalar_select %p297_p11, %s4308_s21, 1  ;;  %v385_v5 = vld [vmem:[%s5407_s2 + $0xa] sm:$0x3]  ;;  %vm582_vm2 = vcmask 31744   ;;  %v845_v25 = vsel %vm631_vm0, %v380_v4, 0 }
  0x1b   : > { %4132 = vmatprep.subr.msk.bf16.mxu1 %vm631_vm0, %v380_v4  ;;  %4137 = vmatprep.subr.msk.bf16.mxu0 %vm631_vm0, %v385_v5  ;;  %v4514_v39 = vld [vmem:[%s5407_s2 + $0x4] sm:$0x3]  ;;  %v1803_v41 = vsel %vm631_vm0, %v385_v5, 0  ;;  %v4543_v57 = vld [vmem:[%s5407_s2 + $0xc] sm:$0x3]  ;;  %vm1008_vm3 = vcmask 1045504  }
  0x1c   : > { %s4141_s16 = smul.u32 768, %s4429_s13  ;;  %s3318_s9 = sshll.u32 %s4308_s21, 11 }
  0x1e   : > { %s4442_s25 = scalar_lea.vmem %s5405_s0, %s4141_s16  ;;  %s3285_s14 = sadd.s32 384, %s4141_s16 }
  0x1f   : > { %v4445_v6 = vld [vmem:[%s4442_s25] sm:$0xff]  ;;  %v4448_v7 = vld [vmem:[%s4442_s25 + $0x8] sm:$0xff]  ;;  %v4451_v8 = vld [vmem:[%s4442_s25 + $0x10] sm:$0x3]  ;;  %s4981_s16 = scalar_lea.vmem %s5406_s1, %s3285_s14  ;;  %s5322_s14 = scalar_lea.hbm %s5409_s4, %s3318_s9 }
  0x20   : > { %v454_v9 = vrot.slane %v4445_v6, 1  ;;  %v455_v10 = vrot.slane %v4448_v7, 1  ;;  %v457_v11 = vrot.slane %v4451_v8, 1  ;;  %v4457_v12 = vld [vmem:[%s4442_s25 + $0x18] sm:$0xff]  ;;  %v4460_v13 = vld [vmem:[%s4442_s25 + $0x20] sm:$0xff]  ;;  %v4471_v17 = vld [vmem:[%s4442_s25 + $0x30] sm:$0xff] }
  0x21   : > { %v4463_v14 = vld [vmem:[%s4442_s25 + $0x28] sm:$0x3]  ;;  %v4467_v15 = vpack.c.bf16 %v4460_v13, %v4457_v12  ;;  %v459_v16 = vrot.slane %v4457_v12, 1  ;;  %v460_v20 = vrot.slane %v4460_v13, 1  ;;  %v4478_v22 = vld [vmem:[%s4442_s25 + $0x38] sm:$0xff]  ;;  %v4488_v27 = vld [vmem:[%s4442_s25 + $0x50] sm:$0xff] }
  0x22   : > { %v456_v18 = vsel %vm453_vm1, %v454_v9, %v455_v10  ;;  %v458_v19 = vsel %vm453_vm1, %v455_v10, %v457_v11  ;;  %v462_v21 = vrot.slane %v4463_v14, 1  ;;  %v4481_v23 = vld [vmem:[%s4442_s25 + $0x40] sm:$0x3]  ;;  %v4485_v26 = vld [vmem:[%s4442_s25 + $0x48] sm:$0xff]  ;;  %v464_v30 = vrot.slane %v4471_v17, 1  ;;  %v4509_v38 = vld [vmem:[%s4442_s25 + $0x78] sm:$0xff] }
  0x23   : > { %v566_v24 = vpack.c.bf16 %v458_v19, %v456_v18  ;;  %v461_v28 = vsel %vm453_vm1, %v459_v16, %v460_v20  ;;  %v465_v31 = vrot.slane %v4478_v22, 1  ;;  %v4495_v32 = vld [vmem:[%s4442_s25 + $0x58] sm:$0x3]  ;;  %v4498_v33 = vld [vmem:[%s4442_s25 + $0x60] sm:$0xff]  ;;  %v4501_v34 = vld [vmem:[%s4442_s25 + $0x68] sm:$0xff]  ;;  %v467_v36 = vrot.slane %v4481_v23, 1 }
  0x24   : > { %v463_v29 = vsel %vm453_vm1, %v460_v20, %v462_v21  ;;  %v4506_v37 = vld [vmem:[%s4442_s25 + $0x70] sm:$0x3]  ;;  %v469_v42 = vrot.slane %v4485_v26, 1  ;;  %v470_v43 = vrot.slane %v4488_v27, 1  ;;  %v4521_v44 = vld [vmem:[%s4442_s25 + $0x80] sm:$0xff]  ;;  %v472_v47 = vrot.slane %v4495_v32, 1 }
  0x25   : > { %3569 = vmatprep.mubr.msk.bf16.mxu1 %vm582_vm2, %v566_v24  ;;  %v567_v35 = vpack.c.bf16 %v463_v29, %v461_v28  ;;  %v466_v40 = vsel %vm453_vm1, %v464_v30, %v465_v31  ;;  %v4524_v45 = vld [vmem:[%s4442_s25 + $0x88] sm:$0x3]  ;;  %v468_v46 = vsel %vm453_vm1, %v465_v31, %v467_v36  ;;  %v474_v48 = vrot.slane %v4498_v33, 1  ;;  %v4560_v63 = vld [vmem:[%s4442_s25 + $0x90] sm:$0xff]  ;;  %v4563_v0 = vld [vmem:[%s4442_s25 + $0x98] sm:$0xff] }
  0x26   : > { %v475_v49 = vrot.slane %v4501_v34, 1  ;;  %v4532_v50 = vpack.c.bf16 %v468_v46, %v466_v40  ;;  %v471_v51 = vsel %vm453_vm1, %v469_v42, %v470_v43  ;;  %v477_v52 = vrot.slane %v4506_v37, 1  ;;  %v4566_v2 = vld [vmem:[%s4442_s25 + $0xa0] sm:$0x3]  ;;  %v4571_v4 = vld [vmem:[%s4442_s25 + $0xa8] sm:$0xff]  ;;  %v4574_v5 = vld [vmem:[%s4442_s25 + $0xb0] sm:$0xff] }
  0x27   : > { %3705 = vmatprep.mubr.msk.bf16.mxu0 %vm582_vm2, %v567_v35  ;;  %3570 = vmatmul.mubr.msk.bf16.vlgmr.msra.gmra.mrb[0].mxu1 %vm582_vm2, %v567_v35  ;;  %v479_v53 = vrot.slane %v4509_v38, 1  ;;  %v473_v54 = vsel %vm453_vm1, %v470_v43, %v472_v47  ;;  %v480_v55 = vrot.slane %v4521_v44, 1  ;;  %v482_v56 = vrot.slane %v4524_v45, 1  ;;  %v4577_v9 = vld [vmem:[%s4442_s25 + $0xb8] sm:$0x3]  ;;  %v4600_v29 = vld [vmem:[%s4442_s25 + $0xc0] sm:$0xff] }
  0x28   : > { %3602 = vmatpush3.bf16.msra.mxu1 %v845_v25  ;;  %5440 = vst [vmem:[#allocation10_spill] sm:$0xff] %v4532_v50  ;;  %3706 = vmatmul.mubr.msk.bf16.vlgmr.msra.gmra.mrb[0].mxu0 %vm582_vm2, %v4532_v50  ;;  %v4551_v58 = vpack.c.bf16 %v473_v54, %v471_v51  ;;  %v476_v59 = vsel %vm453_vm1, %v474_v48, %v475_v49  ;;  %v484_v16 = vrot.slane %v4560_v63, 1  ;;  %v485_v18 = vrot.slane %v4563_v0, 1  ;;  %v4603_v30 = vld [vmem:[%s4442_s25 + $0xc8] sm:$0xff]  ;;  %v4608_v36 = vld [vmem:[%s4442_s25 + $0xd0] sm:$0x3] }
  0x29   : > { %4133 = vmatprep.subr.msk.bf16.mxu1 %vm631_vm0, %v4514_v39  ;;  %3573 = vmatprep.mubr.msk.bf16.mxu1 %vm582_vm2, %v4532_v50  ;;  %v478_v60 = vsel %vm453_vm1, %v475_v49, %v477_v52  ;;  %v481_v61 = vsel %vm453_vm1, %v479_v53, %v480_v55  ;;  %v483_v62 = vsel %vm453_vm1, %v480_v55, %v482_v56  ;;  %v487_v19 = vrot.slane %v4566_v2, 1  ;;  %v4631_v49 = vld [vmem:[%s4442_s25 + $0xe8] sm:$0x3]  ;;  %v4636_v53 = vld [vmem:[%s4442_s25 + $0xf0] sm:$0xff]  ;;  %v4639_v54 = vld [vmem:[%s4442_s25 + $0xf8] sm:$0xff] }
  0x2a   : > { %5441 = vst [vmem:[#allocation11_spill] sm:$0xff] %v4551_v58  ;;  %3738 = vmatpush3.bf16.msra.mxu0 %v1803_v41  ;;  %3709 = vmatprep.mubr.msk.bf16.mxu0 %vm582_vm2, %v4551_v58  ;;  %v4579_v10 = vpack.c.bf16 %v478_v60, %v476_v59  ;;  %v4583_v11 = vpack.c.bf16 %v483_v62, %v481_v61  ;;  %v489_v20 = vrot.slane %v4571_v4, 1  ;;  %v490_v21 = vrot.slane %v4574_v5, 1  ;;  %v4648_v61 = vld [vmem:[%s4442_s25 + $0x100] sm:$0x3] }
  0x2b   : > { %4138 = vmatprep.subr.msk.bf16.mxu0 %vm631_vm0, %v4543_v57  ;;  %v492_v24 = vrot.slane %v4577_v9, 1  ;;  %v486_v25 = vsel %vm453_vm1, %v484_v16, %v485_v18  ;;  %v488_v28 = vsel %vm453_vm1, %v485_v18, %v487_v19  ;;  %v1014_v40 = vrot.slane %v4457_v12, 2 }
  0x2c   : > { %5442 = vst [vmem:[#allocation12_spill] sm:$0xff] %v4579_v10  ;;  %5443 = vst [vmem:[#allocation13_spill] sm:$0xff] %v4583_v11  ;;  %v491_v31 = vsel %vm453_vm1, %v489_v20, %v490_v21  ;;  %v1015_v41 = vrot.slane %v4460_v13, 2  ;;  %v1017_v42 = vrot.slane %v4463_v14, 2  ;;  %v4613_v43 = vpack.c.bf16 %v488_v28, %v486_v25  ;;  %v4625_v13 = vld [vmem:[%s4442_s25 + $0xd8] sm:$0xff]  ;;  %v4628_v14 = vld [vmem:[%s4442_s25 + $0xe0] sm:$0xff] }
  0x2d   : > { %v493_v35 = vsel %vm453_vm1, %v490_v21, %v492_v24  ;;  %v494_v46 = vrot.slane %v4600_v29, 1  ;;  %v495_v47 = vrot.slane %v4603_v30, 1  ;;  %v497_v12 = vrot.slane %v4608_v36, 1  ;;  %v4664_v28 = vld [vmem:[%s4442_s25 + $0x108] sm:$0xff] }
  0x2e   : > { %5444 = vst [vmem:[#allocation14_spill] sm:$0xff] %v4613_v43  ;;  %v4619_v48 = vpack.c.bf16 %v493_v35, %v491_v31  ;;  %v1019_v51 = vrot.slane %v4471_v17, 2  ;;  %v1020_v52 = vrot.slane %v4478_v22, 2  ;;  %v1022_v55 = vrot.slane %v4481_v23, 2  ;;  %v4667_v31 = vld [vmem:[%s4442_s25 + $0x110] sm:$0xff] }
  0x2f   : > { %3574 = vmatmul.mubr.msk.bf16.gmra.mrb[4].mxu1 %vm582_vm2, %v4551_v58  ;;  %v496_v56 = vsel %vm453_vm1, %v494_v46, %v495_v47  ;;  %v1016_v59 = vsel %vm1008_vm3, %v1014_v40, %v1015_v41  ;;  %v1018_v60 = vsel %vm1008_vm3, %v1015_v41, %v1017_v42  ;;  %v498_v62 = vsel %vm453_vm1, %v495_v47, %v497_v12  ;;  %v4670_v35 = vld [vmem:[%s4442_s25 + $0x118] sm:$0x3]  ;;  %v4679_v47 = vld [vmem:[%s4442_s25 + $0x120] sm:$0xff] }
  0x30   : > { %3577 = vmatprep.mubr.msk.bf16.mxu1 %vm582_vm2, %v4579_v10  ;;  %3710 = vmatmul.mubr.msk.bf16.gmra.mrb[4].mxu0 %vm582_vm2, %v4579_v10  ;;  %5445 = vst [vmem:[#allocation15_spill] sm:$0xff] %v4619_v48  ;;  %v499_v23 = vrot.slane %v4625_v13, 1  ;;  %v500_v16 = vrot.slane %v4628_v14, 1  ;;  %v502_v18 = vrot.slane %v4631_v49, 1  ;;  %v504_v19 = vrot.slane %v4636_v53, 1  ;;  %v4719_v10 = vld [vmem:[%s4442_s25 + $0x138] sm:$0xff] }
  0x31   : > { %3713 = vmatprep.mubr.msk.bf16.mxu0 %vm582_vm2, %v4583_v11  ;;  %v505_v20 = vrot.slane %v4639_v54, 1  ;;  %v507_v21 = vrot.slane %v4648_v61, 1  ;;  %v4659_v24 = vpack.c.bf16 %v498_v62, %v496_v56  ;;  %v4661_v25 = vpack.c.bf16 %v1018_v60, %v1016_v59  ;;  %v4688_v62 = vld [vmem:[%s4442_s25 + $0x128] sm:$0xff] }
  0x32   : > { %v501_v40 = vsel %vm453_vm1, %v499_v23, %v500_v16  ;;  %v503_v41 = vsel %vm453_vm1, %v500_v16, %v502_v18  ;;  %v1021_v42 = vsel %vm1008_vm3, %v1019_v51, %v1020_v52  ;;  %v1023_v46 = vsel %vm1008_vm3, %v1020_v52, %v1022_v55  ;;  %v4691_v23 = vld [vmem:[%s4442_s25 + $0x130] sm:$0x3] }
  0x33   : > { %5446 = vst [vmem:[#allocation16_spill] sm:$0xff] %v4659_v24  ;;  %v506_v12 = vsel %vm453_vm1, %v504_v19, %v505_v20  ;;  %v1024_v56 = vrot.slane %v4485_v26, 2  ;;  %v1025_v59 = vrot.slane %v4488_v27, 2  ;;  %v1027_v60 = vrot.slane %v4495_v32, 2 }
  0x34   : > { %v508_v51 = vsel %vm453_vm1, %v505_v20, %v507_v21  ;;  %v509_v52 = vrot.slane %v4664_v28, 1  ;;  %v510_v55 = vrot.slane %v4667_v31, 1  ;;  %v512_v16 = vrot.slane %v4670_v35, 1 }
  0x35   : > { %v2003_v32 = vsel %vm631_vm0, %v4543_v57, 0  ;;  %v4703_v18 = vpack.c.bf16 %v503_v41, %v501_v40  ;;  %v514_v19 = vrot.slane %v4679_v47, 1  ;;  %v515_v20 = vrot.slane %v4688_v62, 1 }
  0x36   : > { %v517_v21 = vrot.slane %v4691_v23, 1  ;;  %v4708_v3 = vpack.c.bf16 %v1023_v46, %v1021_v42  ;;  %v1028_v57 = vsel %vm1008_vm3, %v1025_v59, %v1027_v60  ;;  %v513_v40 = vsel %vm453_vm1, %v510_v55, %v512_v16  ;;  %v4722_v42 = vld [vmem:[%s4442_s25 + $0x140] sm:$0xff] }
  0x37   : > { %3578 = vmatmul.mubr.msk.bf16.gmra.mrb[8].mxu1 %vm582_vm2, %v4583_v11  ;;  %5447 = vst [vmem:[#allocation17_spill] sm:$0xff] %v4703_v18  ;;  %v1029_v41 = vrot.slane %v4498_v33, 2  ;;  %v1030_v11 = vrot.slane %v4501_v34, 2  ;;  %v1032_v46 = vrot.slane %v4506_v37, 2  ;;  %v4732_v60 = vpack.c.bf16 %v4478_v22, %v4471_v17  ;;  %v4746_v17 = vld [vmem:[%s4442_s25 + $0x150] sm:$0xff]  ;;  %v4749_v22 = vld [vmem:[%s4442_s25 + $0x158] sm:$0xff] }
  0x38   : > { %3581 = vmatprep.mubr.msk.bf16.mxu1 %vm582_vm2, %v4613_v43  ;;  %3714 = vmatmul.mubr.msk.bf16.gmra.mrb[8].mxu0 %vm582_vm2, %v4613_v43  ;;  %5448 = vst [vmem:[#allocation18_spill] sm:$0xff] %v4708_v3  ;;  %v511_v43 = vsel %vm453_vm1, %v509_v52, %v510_v55  ;;  %v516_v52 = vsel %vm453_vm1, %v514_v19, %v515_v20  ;;  %v1037_v37 = vrot.slane %v4524_v45, 2  ;;  %v519_v16 = vrot.slane %v4719_v10, 1 }
  0x39   : > { %3717 = vmatprep.mubr.msk.bf16.mxu0 %vm582_vm2, %v4619_v48  ;;  %v518_v55 = vsel %vm453_vm1, %v515_v20, %v517_v21  ;;  %v520_v58 = vrot.slane %v4722_v42, 1  ;;  %v1031_v19 = vsel %vm1008_vm3, %v1029_v41, %v1030_v11  ;;  %v4760_v45 = vpack.c.bf16 %v4488_v27, %v4485_v26  ;;  %v4765_v21 = vld [vmem:[%s5407_s2 + $0xe] sm:$0x3] }
  0x3a   : > { %v4775_v41 = vpack.c.bf16 %v4501_v34, %v4498_v33  ;;  %v524_v27 = vrot.slane %v4746_v17, 1  ;;  %v1040_v33 = vrot.slane %v4563_v0, 2  ;;  %v4788_v34 = vpack.c.bf16 %v4521_v44, %v4509_v38 }
  0x3f   : > { %3582 = vmatmul.mubr.msk.bf16.gmra.mrb[12].mxu1 %vm582_vm2, %v4619_v48  ;;  %v4710_v48 = vpack.c.bf16 %v508_v51, %v506_v12  ;;  %v1034_v12 = vrot.slane %v4509_v38, 2  ;;  %v4802_v38 = vld [vmem:[%s4442_s25 + $0x168] sm:$0xff] }
  0x40   : > { %3585 = vmatprep.mubr.msk.bf16.mxu1 %vm582_vm2, %v4659_v24  ;;  %3718 = vmatmul.mubr.msk.bf16.gmra.mrb[12].mxu0 %vm582_vm2, %v4659_v24  ;;  %v1026_v24 = vsel %vm1008_vm3, %v1024_v56, %v1025_v59  ;;  %v1035_v56 = vrot.slane %v4521_v44, 2  ;;  %v4728_v59 = vld [vmem:[%s4442_s25 + $0x148] sm:$0x3]  ;;  %v4806_v44 = vpack.c.bf16 %v4563_v0, %v4560_v63  ;;  %v1012_v0 = vrot.slane %v4451_v8, 2 }
  0x41   : > { %3739 = vmatprep.mubr.msk.bf16.mxu0 %vm582_vm2, %v4661_v25  ;;  %5449 = vst [vmem:[#allocation19_spill] sm:$0xff] %v4710_v48  ;;  %v4736_v51 = vpack.c.bf16 %v1028_v57, %v1026_v24  ;;  %v4754_v24 = vpack.c.bf16 %v513_v40, %v511_v43  ;;  %v522_v20 = vrot.slane %v4728_v59, 1  ;;  %v1033_v57 = vsel %vm1008_vm3, %v1030_v11, %v1032_v46 }
  0x42   : > { %v4770_v43 = vpack.c.bf16 %v518_v55, %v516_v52  ;;  %v1036_v40 = vsel %vm1008_vm3, %v1034_v12, %v1035_v56  ;;  %v1038_v26 = vsel %vm1008_vm3, %v1035_v56, %v1037_v37  ;;  %v521_v46 = vsel %vm453_vm1, %v519_v16, %v520_v58 }
  0x43   : > { %5450 = vst [vmem:[#allocation20_spill] sm:$0xff] %v4736_v51  ;;  %5451 = vst [vmem:[#allocation21_spill] sm:$0xff] %v4754_v24  ;;  %v1039_v12 = vrot.slane %v4560_v63, 2  ;;  %v1042_v56 = vrot.slane %v4566_v2, 2  ;;  %v1044_v52 = vrot.slane %v4571_v4, 2  ;;  %v1045_v55 = vrot.slane %v4574_v5, 2 }
  0x44   : > { %5452 = vst [vmem:[#allocation22_spill] sm:$0xff] %v4770_v43  ;;  %v1009_v37 = vrot.slane %v4445_v6, 2  ;;  %v4797_v16 = vpack.c.bf16 %v1033_v57, %v1031_v19  ;;  %v4799_v50 = vpack.c.bf16 %v1038_v26, %v1036_v40  ;;  %v4817_v19 = vld [vmem:[%s4442_s25 + $0x178] sm:$0x3]  ;;  %v4821_v57 = vpack.c.bf16 %v4574_v5, %v4571_v4 }
  0x45   : > { %v1010_v63 = vrot.slane %v4448_v7, 2  ;;  %v1046_v26 = vsel %vm1008_vm3, %v1044_v52, %v1045_v55  ;;  %v4835_v4 = vpack.c.bf16 %v4603_v30, %v4600_v29  ;;  %v4864_v52 = vpack.c.bf16 %v4722_v42, %v4719_v10 }
  0x46   : > { %5453 = vst [vmem:[#allocation23_spill] sm:$0xff] %v4797_v16  ;;  %5454 = vst [vmem:[#allocation24_spill] sm:$0xff] %v4799_v50 }
  0x47   : > { %3586 = vmatmul.mubr.msk.bf16.gmra.mrb[16].mxu1 %vm582_vm2, %v4703_v18  ;;  %v4752_v18 = vld [vmem:[%s4442_s25 + $0x160] sm:$0x3] }
  0x48   : > { %3589 = vmatprep.mubr.msk.bf16.mxu1 %vm582_vm2, %v4710_v48  ;;  %3740 = vmatmul.mubr.msk.bf16.vlgmr.msra.gmra.mrb[0].mxu0 %vm582_vm2, %v4708_v3  ;;  %v525_v48 = vrot.slane %v4749_v22, 1  ;;  %v527_v11 = vrot.slane %v4752_v18, 1  ;;  %v1052_v3 = vrot.slane %v4608_v36, 2 }
  0x49   : > { %3772 = vmatpush3.bf16.msra.mxu0 %v2003_v32  ;;  %3743 = vmatprep.mubr.msk.bf16.mxu0 %vm582_vm2, %v4736_v51  ;;  %v523_v32 = vsel %vm453_vm1, %v520_v58, %v522_v20  ;;  %v1047_v20 = vrot.slane %v4577_v9, 2  ;;  %v4814_v51 = vld [vmem:[%s4442_s25 + $0x170] sm:$0xff]  ;;  %v1043_v9 = vsel %vm1008_vm3, %v1040_v33, %v1042_v56  ;;  %v4860_v56 = vpack.c.bf16 %v4688_v62, %v4679_v47  ;;  %s5254_s25 = sand.u32 1, %s4300_s19  }
  0x4a   : > { %4139 = vmatprep.subr.msk.bf16.mxu0 %vm631_vm0, %v4765_v21  ;;  %v526_v58 = vsel %vm453_vm1, %v524_v27, %v525_v48  ;;  %v528_v2 = vsel %vm453_vm1, %v525_v48, %v527_v11  ;;  %v4827_v40 = vpack.c.bf16 %v523_v32, %v521_v46  ;;  %v1041_v48 = vsel %vm1008_vm3, %v1039_v12, %v1040_v33  ;;  %s3096_s7 = sshll.u32 %s5254_s25, 7  ;;  %s2924_s13 = scalar_lea.sflag [#allocation3], %s5254_s25 }
  0x4b   : > { %v529_v27 = vrot.slane %v4802_v38, 1  ;;  %v4839_v8 = vpack.c.bf16 %v528_v2, %v526_v58  ;;  %v530_v5 = vrot.slane %v4814_v51, 1  ;;  %v532_v11 = vrot.slane %v4817_v19, 1  ;;  %s5266_s8 = scalar_lea.vmem [#allocation2], %s3096_s7 }
  0x4c   : > { %v4845_v46 = vpack.c.bf16 %v4628_v14, %v4625_v13  ;;  %v1048_v12 = vsel %vm1008_vm3, %v1045_v55, %v1047_v20  ;;  %v4852_v33 = vpack.c.bf16 %v4639_v54, %v4636_v53  ;;  %v4856_v32 = vpack.c.bf16 %v4667_v31, %v4664_v28  ;;  %s2943_s10 = sshll.u32 %s5266_s8, 4  ;;  %s5324_s10 = int_to_ptr.vmem [resolvable:$true] %s2943_s10 }
  0x4d   : > { %v4868_v58 = vpack.c.bf16 %v4749_v22, %v4746_v17  ;;  %v4872_v55 = vpack.c.bf16 %v4814_v51, %v4802_v38  ;;  %v4875_v2 = vsel %vm1008_vm3, %v1009_v37, %v1010_v63  ;;  %v4878_v20 = vsel %vm1008_vm3, %v1010_v63, %v1012_v0  ;;  %s4206_s15 = scalar_lea.vmem %s5324_s10, 2048 }
  0x4e   : > { %v531_v1 = vsel %vm453_vm1, %v529_v27, %v530_v5  ;;  %v1050_v37 = vrot.slane %v4603_v30, 2  ;;  %v533_v63 = vsel %vm453_vm1, %v530_v5, %v532_v11  ;;  %v1055_v0 = vrot.slane %v4628_v14, 2  ;;  %p4207_p12 = scmp.ne.s32.totalorder %s5324_s10, %s4206_s15 }
  0x4f   : > { %3590 = vmatmul.mubr.msk.bf16.gmra.mrb[20].mxu1 %vm582_vm2, %v4754_v24  ;;  %v1049_v24 = vrot.slane %v4600_v29, 2  ;;  %v1054_v29 = vrot.slane %v4625_v13, 2  ;;  %v4902_v30 = vpack.c.bf16 %v533_v63, %v531_v1  ;;  %v1059_v1 = vrot.slane %v4636_v53, 2 }
  0x50   : > { %3593 = vmatprep.mubr.msk.bf16.mxu1 %vm582_vm2, %v4770_v43  ;;  %3744 = vmatmul.mubr.msk.bf16.gmra.mrb[4].mxu0 %vm582_vm2, %v4797_v16  ;;  %v4880_v43 = vpack.c.bf16 %v1043_v9, %v1041_v48  ;;  %v4887_v16 = vpack.c.bf16 %v1048_v12, %v1046_v26  ;;  %v1057_v48 = vrot.slane %v4631_v49, 2  ;;  %v1053_v9 = vsel %vm1008_vm3, %v1050_v37, %v1052_v3  ;;  %p4208_p13 = pnand %p4207_p12, %p4392_p4 }
  0x51   : > { %3747 = vmatprep.mubr.msk.bf16.mxu0 %vm582_vm2, %v4799_v50  ;;  %v1121_v50 = vpack.c.bf16 %v4878_v20, %v4875_v2  ;;  %v1051_v36 = vsel %vm1008_vm3, %v1049_v24, %v1050_v37  ;;  %v389_v26 = vpack.c.bf16 %v4448_v7, %v4445_v6  ;;  %v1056_v13 = vsel %vm1008_vm3, %v1054_v29, %v1055_v0  ;;  %v5456_v2 = vld [vmem:[#allocation8_spill] sm:$0xff]  ;;  %v5458_v20 = vld [vmem:[#allocation23_spill] sm:$0xff] }
  0x52   : > { %v1058_v14 = vsel %vm1008_vm3, %v1055_v0, %v1057_v48  ;;  %v4910_v49 = vpack.c.bf16 %v1053_v9, %v1051_v36  ;;  %v1060_v24 = vrot.slane %v4639_v54, 2  ;;  %v1062_v3 = vrot.slane %v4648_v61, 2  ;;  %p4209_p0 = pneg %p4208_p13 }
  0x53   : > { %v4914_v27 = vpack.c.bf16 %v1058_v14, %v1056_v13  ;;  %v1064_v6 = vrot.slane %v4664_v28, 2  ;;  %v1065_v7 = vrot.slane %v4667_v31, 2  ;;  %v1067_v5 = vrot.slane %v4670_v35, 2  ;;  %v4938_v35 = vld [vmem:[%s5407_s2 + $0x6] sm:$0x3] }
  0x54   : > { %v1061_v53 = vsel %vm1008_vm3, %v1059_v1, %v1060_v24  ;;  %v1063_v54 = vsel %vm1008_vm3, %v1060_v24, %v1062_v3  ;;  %v1186_v28 = vsel %vm631_vm0, %v4514_v39, 0  ;;  %v1069_v37 = vrot.slane %v4679_v47, 2  ;;  %v376_v24 = vld [vmem:[%s4981_s16 + $0x10] sm:$0x3] }
  0x55   : > { %v1066_v61 = vsel %vm1008_vm3, %v1064_v6, %v1065_v7  ;;  %v1068_v11 = vsel %vm1008_vm3, %v1065_v7, %v1067_v5  ;;  %v4933_v31 = vpack.c.bf16 %v1063_v54, %v1061_v53  ;;  %v1070_v63 = vrot.slane %v4688_v62, 2 }
  0x56   : > { %v4942_v12 = vpack.c.bf16 %v1068_v11, %v1066_v61  ;;  %v1072_v29 = vrot.slane %v4691_v23, 2  ;;  %v1074_v39 = vrot.slane %v4719_v10, 2  ;;  %v1075_v0 = vrot.slane %v4722_v42, 2 }
  0x57   : > { %3594 = vmatmul.mubr.msk.bf16.gmra.mrb[24].mxu1 %vm582_vm2, %v4827_v40  ;;  %v1077_v48 = vrot.slane %v4728_v59, 2  ;;  %v1071_v47 = vsel %vm1008_vm3, %v1069_v37, %v1070_v63  ;;  %v1079_v36 = vrot.slane %v4746_v17, 2  ;;  %v1080_v9 = vrot.slane %v4749_v22, 2 }
  0x58   : > { %3597 = vmatprep.mubr.msk.bf16.mxu1 %vm582_vm2, %v4839_v8  ;;  %3748 = vmatmul.mubr.msk.bf16.gmra.mrb[8].mxu0 %vm582_vm2, %v4880_v43  ;;  %v1073_v62 = vsel %vm1008_vm3, %v1070_v63, %v1072_v29  ;;  %v1076_v23 = vsel %vm1008_vm3, %v1074_v39, %v1075_v0  ;;  %v1084_v13 = vrot.slane %v4802_v38, 2  ;;  %v1085_v14 = vrot.slane %v4814_v51, 2  ;;  %v374_v38 = vld [vmem:[%s4981_s16] sm:$0xff] }
  0x59   : > { %3751 = vmatprep.mubr.msk.bf16.mxu0 %vm582_vm2, %v4887_v16  ;;  %v1078_v10 = vsel %vm1008_vm3, %v1075_v0, %v1077_v48  ;;  %v4962_v42 = vpack.c.bf16 %v1073_v62, %v1071_v47  ;;  %v1087_v1 = vrot.slane %v4817_v19, 2  ;;  %v375_v19 = vld [vmem:[%s4981_s16 + $0x8] sm:$0xff]  ;;  %v1791_v7 = vrot.slane %v374_v38, 2  ;;  %v388_v47 = vld [vmem:[%s5407_s2 + $0x10] sm:$0x3]  ;;  %v5455_v62 = vld [vmem:[#allocation18_spill] sm:$0xff] }
  0x5a   : > { %v4968_v59 = vpack.c.bf16 %v1078_v10, %v1076_v23  ;;  %v1086_v17 = vsel %vm1008_vm3, %v1084_v13, %v1085_v14  ;;  %v1792_v5 = vrot.slane %v375_v19, 2  ;;  %v1794_v53 = vrot.slane %v376_v24, 2  ;;  %v377_v23 = vld [vmem:[%s4981_s16 + $0x18] sm:$0xff]  ;;  %v378_v10 = vld [vmem:[%s4981_s16 + $0x20] sm:$0xff] }
  0x5b   : > { %v1088_v22 = vsel %vm1008_vm3, %v1085_v14, %v1087_v1  ;;  %v1584_v54 = vrot.slane %v374_v38, 1  ;;  %v1585_v61 = vrot.slane %v375_v19, 1  ;;  %v1587_v11 = vrot.slane %v376_v24, 1  ;;  %v5463_v24 = vld [vmem:[#allocation13_spill] sm:$0xff] }
  0x5c   : > { %v4998_v6 = vpack.c.bf16 %v1088_v22, %v1086_v17  ;;  %v1795_v37 = vsel %vm1008_vm3, %v1792_v5, %v1794_v53  ;;  %v2213_v48 = vsel %vm631_vm0, %v4765_v21, 0  ;;  %v1386_v21 = vsel %vm631_vm0, %v4938_v35, 0  ;;  %v5460_v17 = vld [vmem:[#allocation10_spill] sm:$0xff]  ;;  %v5466_v53 = vld [vmem:[#allocation16_spill] sm:$0xff] }
  0x5d   : > { %v1586_v63 = vsel %vm453_vm1, %v1584_v54, %v1585_v61  ;;  %v1588_v29 = vsel %vm453_vm1, %v1585_v61, %v1587_v11  ;;  %v1998_v14 = vpack.c.bf16 %v378_v10, %v377_v23  ;;  %v2420_v22 = vsel %vm631_vm0, %v388_v47, 0  ;;  %v5467_v54 = vld [vmem:[#allocation17_spill] sm:$0xff]  ;;  %v5468_v61 = vld [vmem:[#allocation19_spill] sm:$0xff] }
  0x5e   : > { %v5010_v39 = vpack.c.bf16 %v1588_v29, %v1586_v63  ;;  %v5469_v11 = vld [vmem:[#allocation9_spill] sm:$0xff] }
  0x5f   : > { %3598 = vmatmul.mubr.msk.bf16.gmra.mrb[28].mxu1 %vm582_vm2, %v4902_v30 }
  0x60   : > { %3603 = vmatprep.mubr.msk.bf16.mxu1 %vm582_vm2, %v389_v26  ;;  %3752 = vmatmul.mubr.msk.bf16.gmra.mrb[12].mxu0 %vm582_vm2, %v4910_v49  ;;  %v1082_v26 = vrot.slane %v4752_v18, 2  ;;  %v1081_v18 = vsel %vm1008_vm3, %v1079_v36, %v1080_v9  ;;  %v2408_v36 = vrot.slane %v377_v23, 2 }
  0x61   : > { %3755 = vmatprep.mubr.msk.bf16.mxu0 %vm582_vm2, %v4914_v27 }
  0x62   : > { %v1083_v51 = vsel %vm1008_vm3, %v1080_v9, %v1082_v26  ;;  %v2409_v9 = vrot.slane %v378_v10, 2  ;;  %v379_v26 = vld [vmem:[%s4981_s16 + $0x28] sm:$0x3]  ;;  %s4318_s16 = smov [#allocation2]  }
  0x63   : > { %v4994_v3 = vpack.c.bf16 %v1083_v51, %v1081_v18  ;;  %v2411_v13 = vrot.slane %v379_v26, 2  ;;  %s4210_s17 = sshll.u32 %s4318_s16, 4  ;;  %s4211_s17 = int_to_ptr.vmem [resolvable:$false] %s4210_s17 }
  0x64   : > { %v5098_v1 = vsel %vm1008_vm3, %v2408_v36, %v2409_v9  ;;  %s4212_s24 = scalar_lea.vmem %s4211_s17, 4096  ;;  %p4213_p1 = scmp.lt.s32.totalorder %s5324_s10, %s4211_s17 }
  0x65   : > { %v5101_v18 = vsel %vm1008_vm3, %v2409_v9, %v2411_v13  ;;  %p4214_p2 = scmp.lt.s32.totalorder %s4212_s24, %s4206_s15 }
  0x66   : > { %v2415_v51 = vpack.c.bf16 %v5101_v18, %v5098_v1 }
  0x67   : > { %3604 = vmatmul.mubr.msk.bf16.vlgmr.msra.gmra.mrb[0].mxu1 %vm582_vm2, %v4467_v15  ;;  %p4215_p3 = por %p4214_p2, %p4213_p1 }
  0x68   : > { %3636 = vmatpush3.bf16.msra.mxu1 %v1186_v28  ;;  %3607 = vmatprep.mubr.msk.bf16.mxu1 %vm582_vm2, %v4732_v60  ;;  %v1793_v28 = vsel %vm1008_vm3, %v1791_v7, %v1792_v5  ;;  %v5464_v7 = vld [vmem:[#allocation14_spill] sm:$0xff]  ;;  %v5465_v5 = vld [vmem:[#allocation15_spill] sm:$0xff] }
  0x69   : > { %4134 = vmatprep.subr.msk.bf16.mxu1 %vm631_vm0, %v4938_v35  ;;  %3756 = vmatmul.mubr.msk.bf16.gmra.mrb[16].mxu0 %vm582_vm2, %v4933_v31  ;;  %v5012_v0 = vpack.c.bf16 %v1795_v37, %v1793_v28  ;;  %v5084_v35 = vpack.c.bf16 %v375_v19, %v374_v38  ;;  %v5461_v38 = vld [vmem:[#allocation11_spill] sm:$0xff]  ;;  %v5462_v19 = vld [vmem:[#allocation12_spill] sm:$0xff]  ;;  %v5470_v28 = vld [vmem:[#allocation21_spill] sm:$0xff]  ;;  %p4216_p5 = pnand %p4215_p3, %p4209_p0 }
  0x6a   : > { %3759 = vmatprep.mubr.msk.bf16.mxu0 %vm582_vm2, %v4942_v12  ;;  %v5471_v37 = vld [vmem:[#allocation22_spill] sm:$0xff] }
  0x6f   : > { %3608 = vmatmul.mubr.msk.bf16.gmra.mrb[4].mxu1 %vm582_vm2, %v4760_v45 }
  0x70   : > { %3611 = vmatprep.mubr.msk.bf16.mxu1 %vm582_vm2, %v4775_v41 }
  0x71   : > { %3760 = vmatmul.mubr.msk.bf16.gmra.mrb[20].mxu0 %vm582_vm2, %v4962_v42 }
  0x72   : > { %3763 = vmatprep.mubr.msk.bf16.mxu0 %vm582_vm2, %v4968_v59 }
  0x77   : > { %3612 = vmatmul.mubr.msk.bf16.gmra.mrb[8].mxu1 %vm582_vm2, %v4788_v34 }
  0x78   : > { %3615 = vmatprep.mubr.msk.bf16.mxu1 %vm582_vm2, %v4806_v44 }
  0x79   : > { %3764 = vmatmul.mubr.msk.bf16.gmra.mrb[24].mxu0 %vm582_vm2, %v4994_v3 }
  0x7a   : > { %3767 = vmatprep.mubr.msk.bf16.mxu0 %vm582_vm2, %v4998_v6 }
  0x7f   : > { %3616 = vmatmul.mubr.msk.bf16.gmra.mrb[12].mxu1 %vm582_vm2, %v4821_v57 }
  0x80   : > { %3619 = vmatprep.mubr.msk.bf16.mxu1 %vm582_vm2, %v4835_v4 }
  0x81   : > { %3768 = vmatmul.mubr.msk.bf16.gmra.mrb[28].mxu0 %vm582_vm2, %v5012_v0 }
  0x82   : > { %3773 = vmatprep.mubr.msk.bf16.mxu0 %vm582_vm2, %v4732_v60 }
  0x87   : > { %3620 = vmatmul.mubr.msk.bf16.gmra.mrb[16].mxu1 %vm582_vm2, %v4845_v46 }
  0x88   : > { %3623 = vmatprep.mubr.msk.bf16.mxu1 %vm582_vm2, %v4852_v33 }
  0x89   : > { %3774 = vmatmul.mubr.msk.bf16.vlgmr.msra.gmra.mrb[0].mxu0 %vm582_vm2, %v4760_v45 }
  0x8a   : > { %3806 = vmatpush3.bf16.msra.mxu0 %v2213_v48  ;;  %3777 = vmatprep.mubr.msk.bf16.mxu0 %vm582_vm2, %v4775_v41 }
  0x8b   : > { %4140 = vmatprep.subr.msk.bf16.mxu0 %vm631_vm0, %v388_v47 }
  0x8f   : > { %3624 = vmatmul.mubr.msk.bf16.gmra.mrb[20].mxu1 %vm582_vm2, %v4856_v32 }
  0x90   : > { %3627 = vmatprep.mubr.msk.bf16.mxu1 %vm582_vm2, %v4860_v56 }
  0x91   : > { %3778 = vmatmul.mubr.msk.bf16.gmra.mrb[4].mxu0 %vm582_vm2, %v4788_v34 }
  0x92   : > { %3781 = vmatprep.mubr.msk.bf16.mxu0 %vm582_vm2, %v4806_v44 }
  0x97   : > { %3628 = vmatmul.mubr.msk.bf16.gmra.mrb[24].mxu1 %vm582_vm2, %v4864_v52 }
  0x98   : > { %3631 = vmatprep.mubr.msk.bf16.mxu1 %vm582_vm2, %v4868_v58 }
  0x99   : > { %3782 = vmatmul.mubr.msk.bf16.gmra.mrb[8].mxu0 %vm582_vm2, %v4821_v57 }
  0x9a   : > { %3785 = vmatprep.mubr.msk.bf16.mxu0 %vm582_vm2, %v4835_v4 }
  0x9f   : > { %3632 = vmatmul.mubr.msk.bf16.gmra.mrb[28].mxu1 %vm582_vm2, %v4872_v55 }
  0xa0   : > { %3637 = vmatprep.mubr.msk.bf16.mxu1 %vm582_vm2, %v1121_v50  ;;  %v5457_v50 = vld [vmem:[#allocation20_spill] sm:$0xff] }
  0xa1   : > { %3786 = vmatmul.mubr.msk.bf16.gmra.mrb[12].mxu0 %vm582_vm2, %v4845_v46 }
  0xa2   : > { %3789 = vmatprep.mubr.msk.bf16.mxu0 %vm582_vm2, %v4852_v33 }
  0xa7   : > { %3638 = vmatmul.mubr.msk.bf16.vlgmr.msra.gmra.mrb[0].mxu1 %vm582_vm2, %v4661_v25  ;;  %v5459_v25 = vld [vmem:[#allocation24_spill] sm:$0xff] }
  0xa8   : > { %3670 = vmatpush3.bf16.msra.mxu1 %v1386_v21  ;;  %3641 = vmatprep.mubr.msk.bf16.mxu1 %vm582_vm2, %v5455_v62 }
  0xa9   : > { %4136 = vmatprep.subr.msk.bf16.mxu1 %vm631_vm0, %v5456_v2  ;;  %3790 = vmatmul.mubr.msk.bf16.gmra.mrb[16].mxu0 %vm582_vm2, %v4856_v32 }
  0xaa   : > { %3793 = vmatprep.mubr.msk.bf16.mxu0 %vm582_vm2, %v4860_v56 }
  0xaf   : > { %3642 = vmatmul.mubr.msk.bf16.gmra.mrb[4].mxu1 %vm582_vm2, %v5457_v50 }
  0xb0   : > { %3645 = vmatprep.mubr.msk.bf16.mxu1 %vm582_vm2, %v5458_v20 }
  0xb1   : > { %3794 = vmatmul.mubr.msk.bf16.gmra.mrb[20].mxu0 %vm582_vm2, %v4864_v52 }
  0xb2   : > { %3797 = vmatprep.mubr.msk.bf16.mxu0 %vm582_vm2, %v4868_v58 }
  0xb7   : > { %3646 = vmatmul.mubr.msk.bf16.gmra.mrb[8].mxu1 %vm582_vm2, %v5459_v25 }
  0xb8   : > { %3649 = vmatprep.mubr.msk.bf16.mxu1 %vm582_vm2, %v4880_v43 }
  0xb9   : > { %3798 = vmatmul.mubr.msk.bf16.gmra.mrb[24].mxu0 %vm582_vm2, %v4872_v55 }
  0xba   : > { %3801 = vmatprep.mubr.msk.bf16.mxu0 %vm582_vm2, %v5084_v35 }
  0xbf   : > { %3650 = vmatmul.mubr.msk.bf16.gmra.mrb[12].mxu1 %vm582_vm2, %v4887_v16 }
  0xc0   : > { %3653 = vmatprep.mubr.msk.bf16.mxu1 %vm582_vm2, %v4910_v49 }
  0xc1   : > { %3802 = vmatmul.mubr.msk.bf16.gmra.mrb[28].mxu0 %vm582_vm2, %v1998_v14 }
  0xc2   : > { %3807 = vmatprep.mubr.msk.bf16.mxu0 %vm582_vm2, %v5460_v17 }
  0xc7   : > { %3654 = vmatmul.mubr.msk.bf16.gmra.mrb[16].mxu1 %vm582_vm2, %v4914_v27 }
  0xc8   : > { %3657 = vmatprep.mubr.msk.bf16.mxu1 %vm582_vm2, %v4933_v31 }
  0xc9   : > { %3808 = vmatmul.mubr.msk.bf16.vlgmr.msra.gmra.mrb[0].mxu0 %vm582_vm2, %v5461_v38 }
  0xca   : > { %3840 = vmatpush3.bf16.msra.mxu0 %v2420_v22  ;;  %3811 = vmatprep.mubr.msk.bf16.mxu0 %vm582_vm2, %v5462_v19 }
  0xcf   : > { %3658 = vmatmul.mubr.msk.bf16.gmra.mrb[20].mxu1 %vm582_vm2, %v4942_v12 }
  0xd0   : > { %3661 = vmatprep.mubr.msk.bf16.mxu1 %vm582_vm2, %v4962_v42 }
  0xd1   : > { %3812 = vmatmul.mubr.msk.bf16.gmra.mrb[4].mxu0 %vm582_vm2, %v5463_v24 }
  0xd2   : > { %3815 = vmatprep.mubr.msk.bf16.mxu0 %vm582_vm2, %v5464_v7 }
  0xd7   : > { %3662 = vmatmul.mubr.msk.bf16.gmra.mrb[24].mxu1 %vm582_vm2, %v4968_v59 }
  0xd8   : > { %3665 = vmatprep.mubr.msk.bf16.mxu1 %vm582_vm2, %v4994_v3 }
  0xd9   : > { %3816 = vmatmul.mubr.msk.bf16.gmra.mrb[8].mxu0 %vm582_vm2, %v5465_v5 }
  0xda   : > { %3819 = vmatprep.mubr.msk.bf16.mxu0 %vm582_vm2, %v5466_v53 }
  0xdf   : > { %3666 = vmatmul.mubr.msk.bf16.gmra.mrb[28].mxu1 %vm582_vm2, %v4998_v6 }
  0xe0   : > { %3671 = vmatprep.mubr.msk.bf16.mxu1 %vm582_vm2, %v4467_v15  ;;  %v2201_v15 = vrot.slane %v377_v23, 1 }
  0xe1   : > { %3820 = vmatmul.mubr.msk.bf16.gmra.mrb[12].mxu0 %vm582_vm2, %v5467_v54 }
  0xe2   : > { %3823 = vmatprep.mubr.msk.bf16.mxu0 %vm582_vm2, %v5468_v61 }
  0xe7   : > { %3672 = vmatmul.mubr.msk.bf16.vlgmr.msra.gmra.mrb[0].mxu1 %vm582_vm2, %v4732_v60  ;;  %v2202_v60 = vrot.slane %v378_v10, 1 }
  0xe8   : > { %3874 = vmatpush3.bf16.msra.mxu1 %v5469_v11  ;;  %3675 = vmatprep.mubr.msk.bf16.mxu1 %vm582_vm2, %v4760_v45  ;;  %v2204_v45 = vrot.slane %v379_v26, 1 }
  0xe9   : > { %3824 = vmatmul.mubr.msk.bf16.gmra.mrb[16].mxu0 %vm582_vm2, %v5470_v28 }
  0xea   : > { %3827 = vmatprep.mubr.msk.bf16.mxu0 %vm582_vm2, %v5471_v37 }
  0xef   : > { %3676 = vmatmul.mubr.msk.bf16.gmra.mrb[4].mxu1 %vm582_vm2, %v4775_v41  ;;  %v2203_v41 = vsel %vm453_vm1, %v2201_v15, %v2202_v60 }
  0xf0   : > { %3679 = vmatprep.mubr.msk.bf16.mxu1 %vm582_vm2, %v4788_v34  ;;  %v2205_v34 = vsel %vm453_vm1, %v2202_v60, %v2204_v45 }
  0xf1   : > { %3828 = vmatmul.mubr.msk.bf16.gmra.mrb[20].mxu0 %vm582_vm2, %v4827_v40  ;;  %v2208_v63 = vpack.c.bf16 %v2205_v34, %v2203_v41 }
  0xf2   : > { %3831 = vmatprep.mubr.msk.bf16.mxu0 %vm582_vm2, %v4839_v8 }
  0xf7   : > { %3680 = vmatmul.mubr.msk.bf16.gmra.mrb[8].mxu1 %vm582_vm2, %v4806_v44 }
  0xf8   : > { %3683 = vmatprep.mubr.msk.bf16.mxu1 %vm582_vm2, %v4821_v57 }
  0xf9   : > { %3832 = vmatmul.mubr.msk.bf16.gmra.mrb[24].mxu0 %vm582_vm2, %v4902_v30 }
  0xfa   : > { %3835 = vmatprep.mubr.msk.bf16.mxu0 %vm582_vm2, %v5010_v39 }
  0xff   : > { %3684 = vmatmul.mubr.msk.bf16.gmra.mrb[12].mxu1 %vm582_vm2, %v4835_v4 }
 0x100   : > { %3687 = vmatprep.mubr.msk.bf16.mxu1 %vm582_vm2, %v4845_v46 }
 0x101   : > { %3836 = vmatmul.mubr.msk.bf16.gmra.mrb[28].mxu0 %vm582_vm2, %v2208_v63 }
 0x102   : > { %3841 = vmatprep.mubr.msk.bf16.mxu0 %vm582_vm2, %v5455_v62 }
 0x107   : > { %3688 = vmatmul.mubr.msk.bf16.gmra.mrb[16].mxu1 %vm582_vm2, %v4852_v33 }
 0x108   : > { %3691 = vmatprep.mubr.msk.bf16.mxu1 %vm582_vm2, %v4856_v32 }
 0x109   : > { %3842 = vmatmul.mubr.msk.bf16.vlgmr.msra.gmra.mrb[0].mxu0 %vm582_vm2, %v5457_v50 }
 0x10a   : > { %3845 = vmatprep.mubr.msk.bf16.mxu0 %vm582_vm2, %v5458_v20 }
 0x10f   : > { %3692 = vmatmul.mubr.msk.bf16.gmra.mrb[20].mxu1 %vm582_vm2, %v4860_v56 }
 0x110   : > { %3695 = vmatprep.mubr.msk.bf16.mxu1 %vm582_vm2, %v4864_v52 }
 0x111   : > { %3846 = vmatmul.mubr.msk.bf16.gmra.mrb[4].mxu0 %vm582_vm2, %v5459_v25 }
 0x112   : > { %3849 = vmatprep.mubr.msk.bf16.mxu0 %vm582_vm2, %v4880_v43 }
 0x117   : > { %3696 = vmatmul.mubr.msk.bf16.gmra.mrb[24].mxu1 %vm582_vm2, %v4868_v58 }
 0x118   : > { %3699 = vmatprep.mubr.msk.bf16.mxu1 %vm582_vm2, %v4872_v55 }
 0x119   : > { %3850 = vmatmul.mubr.msk.bf16.gmra.mrb[8].mxu0 %vm582_vm2, %v4887_v16 }
 0x11a   : > { %3853 = vmatprep.mubr.msk.bf16.mxu0 %vm582_vm2, %v4910_v49 }
 0x11f   : > { %3700 = vmatmul.mubr.msk.bf16.gmra.mrb[28].mxu1 %vm582_vm2, %v5084_v35 }
 0x120   : > { %3721 = vmatprep.mubr.msk.bf16.mxu1 %vm582_vm2, %v5467_v54 }
 0x121   : > { %3854 = vmatmul.mubr.msk.bf16.gmra.mrb[12].mxu0 %vm582_vm2, %v4914_v27 }
 0x122   : > { %3857 = vmatprep.mubr.msk.bf16.mxu0 %vm582_vm2, %v4933_v31 }
 0x127   : > { %3722 = vmatmul.mubr.msk.bf16.vlgmr.msra.gmra.mrb[16].mxu1 %vm582_vm2, %v5468_v61 }
 0x128   : > { %3725 = vmatprep.mubr.msk.bf16.mxu1 %vm582_vm2, %v5470_v28 }
 0x129   : > { %3858 = vmatmul.mubr.msk.bf16.gmra.mrb[16].mxu0 %vm582_vm2, %v4942_v12  ;;  %v5259_v12 = vld [vmem:[%s5408_s3] ss:$0 sm:$0xff] }
 0x12a   : > { %3861 = vmatprep.mubr.msk.bf16.mxu0 %vm582_vm2, %v4962_v42 }
 0x12f   : > { %3726 = vmatmul.mubr.msk.bf16.gmra.mrb[20].mxu1 %vm582_vm2, %v5471_v37 }
 0x130   : > { %3729 = vmatprep.mubr.msk.bf16.mxu1 %vm582_vm2, %v4827_v40 }
 0x131   : > { %3862 = vmatmul.mubr.msk.bf16.gmra.mrb[20].mxu0 %vm582_vm2, %v4968_v59 }
 0x132   : > { %3865 = vmatprep.mubr.msk.bf16.mxu0 %vm582_vm2, %v4994_v3 }
 0x137   : > { %3730 = vmatmul.mubr.msk.bf16.gmra.mrb[24].mxu1 %vm582_vm2, %v4839_v8 }
 0x138   : > { %3733 = vmatprep.mubr.msk.bf16.mxu1 %vm582_vm2, %v4902_v30 }
 0x139   : > { %3866 = vmatmul.mubr.msk.bf16.gmra.mrb[24].mxu0 %vm582_vm2, %v4998_v6 }
 0x13a   : > { %3869 = vmatprep.mubr.msk.bf16.mxu0 %vm582_vm2, %v5012_v0 }
 0x13f   : > { %3734 = vmatmul.mubr.msk.bf16.gmra.mrb[28].mxu1 %vm582_vm2, %v5010_v39 }
 0x141   : > { %3870 = vmatmul.mubr.msk.bf16.gmra.mrb[28].mxu0 %vm582_vm2, %v2415_v51 }
 0x1ba   : > { %v3673_v43 = vpop.f32.mrb[0].mxu1 }
 0x1bb   : > { %v1422_v16 = vpop.f32.mrb[1].mxu1 }
 0x1bc   : > { %v3674_v44 = vpop.f32.mrb[2].mxu1 }
 0x1bd   : > { %v1425_v57 = vpop.f32.mrb[3].mxu1 }
 0x1c2   : > { %v3677_v40 = vpop.f32.mrb[4].mxu1 }
 0x1c3   : > { %v1438_v4 = vpop.f32.mrb[5].mxu1 }
 0x1c4   : > { %v3678_v8 = vpop.f32.mrb[6].mxu1 }
 0x1c5   : > { %v1441_v46 = vpop.f32.mrb[7].mxu1 }
 0x1ca   : > { %v3681_v33 = vpop.f32.mrb[8].mxu1 }
 0x1cb   : > { %v5239_v32 = vpop.f32.mrb[9].mxu1 }
 0x1cc   : > { %v5241_v56 = vpop.f32.mrb[10].mxu1 }
 0x1cd   : > { %v5243_v52 = vpop.f32.mrb[11].mxu1 }
 0x1d2   : > { %v5245_v58 = vpop.f32.mrb[12].mxu1 }
 0x1d3   : > { %v5247_v55 = vpop.f32.mrb[13].mxu1 }
 0x1d4   : > { %v5249_v30 = vpop.f32.mrb[14].mxu1 }
 0x1d5   : > { %v5251_v49 = vpop.f32.mrb[15].mxu1 }
 0x1dc   : > { %v3843_v27 = vpop.f32.mrb[0].mxu0 }
 0x1dd   : > { %v3875_v31 = vadd.f32 %v3843_v27, %v3673_v43  ;;  %v2456_v42 = vpop.f32.mrb[1].mxu0 }
 0x1de   : > { %v3876_v59 = vadd.f32 %v2456_v42, %v1422_v16  ;;  %v3844_v3 = vpop.f32.mrb[2].mxu0 }
 0x1df   : > { %v3877_v6 = vadd.f32 %v3844_v3, %v3674_v44  ;;  %v2459_v29 = vpop.f32.mrb[3].mxu0  ;;  %v2624_v48 = vadd.f32 %v3875_v31, %v5259_v12 }
 0x1e0   : > { %v2622_v39 = vadd.f32 %v3876_v59, %v5259_v12  ;;  %v3878_v0 = vadd.f32 %v2459_v29, %v1425_v57 }
 0x1e1   : > { %v2625_v47 = vadd.f32 %v3877_v6, %v5259_v12  ;;  %v2693_v36 = vmul.f32 %v2624_v48, %v2624_v48 }
 0x1e2   : > { %v2623_v21 = vadd.f32 %v3878_v0, %v5259_v12  ;;  %v2691_v2 = vmul.f32 %v2622_v39, %v2622_v39 }
 0x1e3   : > { %v3327_v62 = vpack.c.bf16 %v2625_v47, %v2624_v48  ;;  %v2694_v1 = vmul.f32 %v2625_v47, %v2625_v47 }
 0x1e4   : > { %v2654_v50 = vadd.f32 %v2623_v21, %v2622_v39  ;;  %v2692_v20 = vmul.f32 %v2623_v21, %v2623_v21  ;;  %v3322_v25 = vpack.c.bf16 %v2623_v21, %v2622_v39  ;;  %v3847_v35 = vpop.f32.mrb[4].mxu0 }
 0x1e5   : > { %3399 = vst [vmem:[%s5266_s8 + $0x8] sm:$0xff] %v3327_v62   ;;  %v3879_v23 = vadd.f32 %v3847_v35, %v3677_v40  ;;  %v2472_v10 = vpop.f32.mrb[5].mxu0 }
 0x1e6   : > { %v2655_v9 = vadd.f32 %v2654_v50, %v2624_v48  ;;  %v2723_v26 = vadd.f32 %v2692_v20, %v2691_v2  ;;  %3323 = vst [vmem:[%s5266_s8] sm:$0xff] %v3322_v25   ;;  %v3880_v13 = vadd.f32 %v2472_v10, %v1438_v4  ;;  %v3848_v14 = vpop.f32.mrb[6].mxu0 }
 0x1e7   : > { %v3881_v18 = vadd.f32 %v3848_v14, %v3678_v8  ;;  %v2475_v51 = vpop.f32.mrb[7].mxu0  ;;  %v2628_v24 = vadd.f32 %v3879_v23, %v5259_v12 }
 0x1e8   : > { %v2724_v17 = vadd.f32 %v2723_v26, %v2693_v36  ;;  %v2626_v22 = vadd.f32 %v3880_v13, %v5259_v12  ;;  %v2656_v38 = vadd.f32 %v2655_v9, %v2625_v47  ;;  %v3882_v19 = vadd.f32 %v2475_v51, %v1441_v46 }
 0x1e9   : > { %v2629_v7 = vadd.f32 %v3881_v18, %v5259_v12  ;;  %v2697_v63 = vmul.f32 %v2628_v24, %v2628_v24 }
 0x1ea   : > { %v2657_v5 = vadd.f32 %v2656_v38, %v2626_v22  ;;  %v2695_v53 = vmul.f32 %v2626_v22, %v2626_v22  ;;  %v2725_v54 = vadd.f32 %v2724_v17, %v2694_v1  ;;  %v2627_v61 = vadd.f32 %v3882_v19, %v5259_v12 }
 0x1eb   : > { %v3337_v11 = vpack.c.bf16 %v2629_v7, %v2628_v24  ;;  %v2698_v40 = vmul.f32 %v2629_v7, %v2629_v7 }
 0x1ec   : > { %v2726_v28 = vadd.f32 %v2725_v54, %v2695_v53  ;;  %v2658_v37 = vadd.f32 %v2657_v5, %v2627_v61  ;;  %v2696_v15 = vmul.f32 %v2627_v61, %v2627_v61  ;;  %v3332_v60 = vpack.c.bf16 %v2627_v61, %v2626_v22  ;;  %v3851_v45 = vpop.f32.mrb[8].mxu0 }
 0x1ed   : > { %3401 = vst [vmem:[%s5266_s8 + $0x18] sm:$0xff] %v3337_v11   ;;  %v3883_v41 = vadd.f32 %v3851_v45, %v3681_v33  ;;  %v2488_v34 = vpop.f32.mrb[9].mxu0 }
 0x1ee   : > { %v2659_v43 = vadd.f32 %v2658_v37, %v2628_v24  ;;  %v2727_v16 = vadd.f32 %v2726_v28, %v2696_v15  ;;  %3400 = vst [vmem:[%s5266_s8 + $0x10] sm:$0xff] %v3332_v60   ;;  %v3884_v44 = vadd.f32 %v2488_v34, %v5239_v32  ;;  %v3852_v57 = vpop.f32.mrb[10].mxu0 }
 0x1ef   : > { %v3885_v4 = vadd.f32 %v3852_v57, %v5241_v56  ;;  %v2491_v8 = vpop.f32.mrb[11].mxu0  ;;  %v2632_v33 = vadd.f32 %v3883_v41, %v5259_v12 }
 0x1f0   : > { %v2728_v46 = vadd.f32 %v2727_v16, %v2697_v63  ;;  %v2630_v27 = vadd.f32 %v3884_v44, %v5259_v12  ;;  %v2660_v31 = vadd.f32 %v2659_v43, %v2629_v7  ;;  %v3886_v42 = vadd.f32 %v2491_v8, %v5243_v52 }
 0x1f1   : > { %v2633_v59 = vadd.f32 %v3885_v4, %v5259_v12  ;;  %v2701_v2 = vmul.f32 %v2632_v33, %v2632_v33 }
 0x1f2   : > { %v2661_v3 = vadd.f32 %v2660_v31, %v2630_v27  ;;  %v2699_v6 = vmul.f32 %v2630_v27, %v2630_v27  ;;  %v2729_v32 = vadd.f32 %v2728_v46, %v2698_v40  ;;  %v2631_v29 = vadd.f32 %v3886_v42, %v5259_v12 }
 0x1f3   : > { %v3347_v39 = vpack.c.bf16 %v2633_v59, %v2632_v33  ;;  %v2702_v23 = vmul.f32 %v2633_v59, %v2633_v59 }
 0x1f4   : > { %v2730_v56 = vadd.f32 %v2729_v32, %v2699_v6  ;;  %v2662_v0 = vadd.f32 %v2661_v3, %v2631_v29  ;;  %v2700_v48 = vmul.f32 %v2631_v29, %v2631_v29  ;;  %v3342_v47 = vpack.c.bf16 %v2631_v29, %v2630_v27  ;;  %v3855_v21 = vpop.f32.mrb[12].mxu0 }
 0x1f5   : > { %3403 = vst [vmem:[%s5266_s8 + $0x28] sm:$0xff] %v3347_v39   ;;  %v3887_v62 = vadd.f32 %v3855_v21, %v5245_v58  ;;  %v2504_v52 = vpop.f32.mrb[13].mxu0 }
 0x1f6   : > { %v2663_v50 = vadd.f32 %v2662_v0, %v2632_v33  ;;  %v2731_v20 = vadd.f32 %v2730_v56, %v2700_v48  ;;  %3402 = vst [vmem:[%s5266_s8 + $0x20] sm:$0xff] %v3342_v47   ;;  %v3888_v25 = vadd.f32 %v2504_v52, %v5247_v55  ;;  %v3856_v35 = vpop.f32.mrb[14].mxu0 }
 0x1f7   : > { %v3889_v10 = vadd.f32 %v3856_v35, %v5249_v30  ;;  %v2507_v36 = vpop.f32.mrb[15].mxu0  ;;  %v2636_v58 = vadd.f32 %v3887_v62, %v5259_v12 }
 0x1f8   : > { %v2732_v9 = vadd.f32 %v2731_v20, %v2701_v2  ;;  %v2634_v26 = vadd.f32 %v3888_v25, %v5259_v12  ;;  %v2664_v13 = vadd.f32 %v2663_v50, %v2633_v59  ;;  %v3890_v14 = vadd.f32 %v2507_v36, %v5251_v49 }
 0x1f9   : > { %v2637_v1 = vadd.f32 %v3889_v10, %v5259_v12  ;;  %v2705_v28 = vmul.f32 %v2636_v58, %v2636_v58 }
 0x1fa   : > { %v3723_v18 = vpop.f32.mrb[16].mxu1  ;;  %v2665_v51 = vadd.f32 %v2664_v13, %v2634_v26  ;;  %v2703_v17 = vmul.f32 %v2634_v26, %v2634_v26  ;;  %v2733_v55 = vadd.f32 %v2732_v9, %v2702_v23  ;;  %v2635_v22 = vadd.f32 %v3890_v14, %v5259_v12 }
 0x1fb   : > { %v1696_v30 = vpop.f32.mrb[17].mxu1  ;;  %v3357_v38 = vpack.c.bf16 %v2637_v1, %v2636_v58  ;;  %v2706_v41 = vmul.f32 %v2637_v1, %v2637_v1 }
 0x1fc   : > { %v3724_v19 = vpop.f32.mrb[18].mxu1  ;;  %v2734_v24 = vadd.f32 %v2733_v55, %v2703_v17  ;;  %v2666_v7 = vadd.f32 %v2665_v51, %v2635_v22  ;;  %v2704_v5 = vmul.f32 %v2635_v22, %v2635_v22  ;;  %v3352_v53 = vpack.c.bf16 %v2635_v22, %v2634_v26  ;;  %v3859_v49 = vpop.f32.mrb[16].mxu0 }
 0x1fd   : > { %v1699_v54 = vpop.f32.mrb[19].mxu1  ;;  %3405 = vst [vmem:[%s5266_s8 + $0x38] sm:$0xff] %v3357_v38   ;;  %v3891_v61 = vadd.f32 %v3859_v49, %v3723_v18  ;;  %v2520_v11 = vpop.f32.mrb[17].mxu0 }
 0x1fe   : > { %v2667_v37 = vadd.f32 %v2666_v7, %v2636_v58  ;;  %v2735_v15 = vadd.f32 %v2734_v24, %v2704_v5  ;;  %3404 = vst [vmem:[%s5266_s8 + $0x30] sm:$0xff] %v3352_v53   ;;  %v3892_v60 = vadd.f32 %v2520_v11, %v1696_v30  ;;  %v3860_v45 = vpop.f32.mrb[18].mxu0 }
 0x1ff   : > { %v3893_v34 = vadd.f32 %v3860_v45, %v3724_v19  ;;  %v2523_v63 = vpop.f32.mrb[19].mxu0  ;;  %v2640_v40 = vadd.f32 %v3891_v61, %v5259_v12 }
 0x200   : > { %v2736_v43 = vadd.f32 %v2735_v15, %v2705_v28  ;;  %v2638_v16 = vadd.f32 %v3892_v60, %v5259_v12  ;;  %v2668_v44 = vadd.f32 %v2667_v37, %v2637_v1  ;;  %v3894_v57 = vadd.f32 %v2523_v63, %v1699_v54 }
 0x201   : > { %v2641_v4 = vadd.f32 %v3893_v34, %v5259_v12  ;;  %v2709_v21 = vmul.f32 %v2640_v40, %v2640_v40 }
 0x202   : > { %v3727_v8 = vpop.f32.mrb[20].mxu1  ;;  %v2669_v46 = vadd.f32 %v2668_v44, %v2638_v16  ;;  %v2707_v27 = vmul.f32 %v2638_v16, %v2638_v16  ;;  %v2737_v31 = vadd.f32 %v2736_v43, %v2706_v41  ;;  %v2639_v42 = vadd.f32 %v3894_v57, %v5259_v12 }
 0x203   : > { %v1712_v33 = vpop.f32.mrb[21].mxu1  ;;  %v3367_v59 = vpack.c.bf16 %v2641_v4, %v2640_v40  ;;  %v2710_v20 = vmul.f32 %v2641_v4, %v2641_v4 }
 0x204   : > { %v3728_v3 = vpop.f32.mrb[22].mxu1  ;;  %v2738_v6 = vadd.f32 %v2737_v31, %v2707_v27  ;;  %v2670_v32 = vadd.f32 %v2669_v46, %v2639_v42  ;;  %v2708_v29 = vmul.f32 %v2639_v42, %v2639_v42  ;;  %v3362_v39 = vpack.c.bf16 %v2639_v42, %v2638_v16  ;;  %v3863_v56 = vpop.f32.mrb[20].mxu0 }
 0x205   : > { %v1715_v0 = vpop.f32.mrb[23].mxu1  ;;  %3407 = vst [vmem:[%s5266_s8 + $0x48] sm:$0xff] %v3367_v59   ;;  %v3895_v48 = vadd.f32 %v3863_v56, %v3727_v8  ;;  %v2536_v47 = vpop.f32.mrb[21].mxu0 }
 0x206   : > { %v2671_v62 = vadd.f32 %v2670_v32, %v2640_v40  ;;  %v2739_v52 = vadd.f32 %v2738_v6, %v2708_v29  ;;  %3406 = vst [vmem:[%s5266_s8 + $0x40] sm:$0xff] %v3362_v39   ;;  %v3896_v2 = vadd.f32 %v2536_v47, %v1712_v33  ;;  %v3864_v50 = vpop.f32.mrb[22].mxu0 }
 0x207   : > { %v3897_v25 = vadd.f32 %v3864_v50, %v3728_v3  ;;  %v2539_v35 = vpop.f32.mrb[23].mxu0  ;;  %v2644_v26 = vadd.f32 %v3895_v48, %v5259_v12 }
 0x208   : > { %v2740_v23 = vadd.f32 %v2739_v52, %v2709_v21  ;;  %v2642_v10 = vadd.f32 %v3896_v2, %v5259_v12  ;;  %v2672_v36 = vadd.f32 %v2671_v62, %v2641_v4  ;;  %v3898_v9 = vadd.f32 %v2539_v35, %v1715_v0 }
 0x209   : > { %v2645_v13 = vadd.f32 %v3897_v25, %v5259_v12  ;;  %v2713_v54 = vmul.f32 %v2644_v26, %v2644_v26 }
 0x20a   : > { %v3731_v14 = vpop.f32.mrb[24].mxu1  ;;  %v2673_v58 = vadd.f32 %v2672_v36, %v2642_v10  ;;  %v2711_v1 = vmul.f32 %v2642_v10, %v2642_v10  ;;  %v2741_v18 = vadd.f32 %v2740_v23, %v2710_v20  ;;  %v2643_v51 = vadd.f32 %v3898_v9, %v5259_v12 }
 0x20b   : > { %v1728_v17 = vpop.f32.mrb[25].mxu1  ;;  %v3377_v55 = vpack.c.bf16 %v2645_v13, %v2644_v26  ;;  %v2714_v15 = vmul.f32 %v2645_v13, %v2645_v13 }
 0x20c   : > { %v3732_v22 = vpop.f32.mrb[26].mxu1  ;;  %v2742_v30 = vadd.f32 %v2741_v18, %v2711_v1  ;;  %v2674_v38 = vadd.f32 %v2673_v58, %v2643_v51  ;;  %v2712_v19 = vmul.f32 %v2643_v51, %v2643_v51  ;;  %v3372_v24 = vpack.c.bf16 %v2643_v51, %v2642_v10  ;;  %v3867_v7 = vpop.f32.mrb[24].mxu0 }
 0x20d   : > { %v1731_v5 = vpop.f32.mrb[27].mxu1  ;;  %3409 = vst [vmem:[%s5266_s8 + $0x58] sm:$0xff] %v3377_v55   ;;  %v3899_v53 = vadd.f32 %v3867_v7, %v3731_v14  ;;  %v2552_v49 = vpop.f32.mrb[25].mxu0 }
 0x20e   : > { %v2675_v61 = vadd.f32 %v2674_v38, %v2644_v26  ;;  %v2743_v11 = vadd.f32 %v2742_v30, %v2712_v19  ;;  %3408 = vst [vmem:[%s5266_s8 + $0x50] sm:$0xff] %v3372_v24   ;;  %v3900_v28 = vadd.f32 %v2552_v49, %v1728_v17  ;;  %v3868_v37 = vpop.f32.mrb[26].mxu0 }
 0x20f   : > { %v3901_v60 = vadd.f32 %v3868_v37, %v3732_v22  ;;  %v2555_v45 = vpop.f32.mrb[27].mxu0  ;;  %v2648_v16 = vadd.f32 %v3899_v53, %v5259_v12 }
 0x210   : > { %v2744_v41 = vadd.f32 %v2743_v11, %v2713_v54  ;;  %v2646_v34 = vadd.f32 %v3900_v28, %v5259_v12  ;;  %v2676_v63 = vadd.f32 %v2675_v61, %v2645_v13  ;;  %v3902_v43 = vadd.f32 %v2555_v45, %v1731_v5 }
 0x211   : > { %v2649_v44 = vadd.f32 %v3901_v60, %v5259_v12  ;;  %v2717_v0 = vmul.f32 %v2648_v16, %v2648_v16 }
 0x212   : > { %v3735_v57 = vpop.f32.mrb[28].mxu1  ;;  %v2677_v40 = vadd.f32 %v2676_v63, %v2646_v34  ;;  %v2715_v4 = vmul.f32 %v2646_v34, %v2646_v34  ;;  %v2745_v8 = vadd.f32 %v2744_v41, %v2714_v15  ;;  %v2647_v46 = vadd.f32 %v3902_v43, %v5259_v12 }
 0x213   : > { %v1744_v27 = vpop.f32.mrb[29].mxu1  ;;  %v3387_v31 = vpack.c.bf16 %v2649_v44, %v2648_v16  ;;  %v2718_v52 = vmul.f32 %v2649_v44, %v2649_v44 }
 0x214   : > { %v3736_v42 = vpop.f32.mrb[30].mxu1  ;;  %v2746_v33 = vadd.f32 %v2745_v8, %v2715_v4  ;;  %v2678_v59 = vadd.f32 %v2677_v40, %v2647_v46  ;;  %v2716_v3 = vmul.f32 %v2647_v46, %v2647_v46  ;;  %v3382_v6 = vpack.c.bf16 %v2647_v46, %v2646_v34  ;;  %v3871_v32 = vpop.f32.mrb[28].mxu0 }
 0x215   : > { %v1747_v29 = vpop.f32.mrb[31].mxu1  ;;  %3411 = vst [vmem:[%s5266_s8 + $0x68] sm:$0xff] %v3387_v31   ;;  %v3903_v39 = vadd.f32 %v3871_v32, %v3735_v57  ;;  %v2568_v56 = vpop.f32.mrb[29].mxu0 }
 0x216   : > { %v2679_v48 = vadd.f32 %v2678_v59, %v2648_v16  ;;  %v2747_v47 = vadd.f32 %v2746_v33, %v2716_v3  ;;  %3410 = vst [vmem:[%s5266_s8 + $0x60] sm:$0xff] %v3382_v6   ;;  %v3904_v21 = vadd.f32 %v2568_v56, %v1744_v27  ;;  %v3872_v62 = vpop.f32.mrb[30].mxu0 }
 0x217   : > { %v3905_v2 = vadd.f32 %v3872_v62, %v3736_v42  ;;  %v2571_v50 = vpop.f32.mrb[31].mxu0  ;;  %v2652_v10 = vadd.f32 %v3903_v39, %v5259_v12 }
 0x218   : > { %v2748_v20 = vadd.f32 %v2747_v47, %v2717_v0  ;;  %v2650_v25 = vadd.f32 %v3904_v21, %v5259_v12  ;;  %v2680_v35 = vadd.f32 %v2679_v48, %v2649_v44  ;;  %v3906_v23 = vadd.f32 %v2571_v50, %v1747_v29 }
 0x219   : > { %v2653_v36 = vadd.f32 %v3905_v2, %v5259_v12  ;;  %v2721_v55 = vmul.f32 %v2652_v10, %v2652_v10 }
 0x21a   : > { %v2681_v9 = vadd.f32 %v2680_v35, %v2650_v25  ;;  %v2719_v26 = vmul.f32 %v2650_v25, %v2650_v25  ;;  %v2749_v13 = vadd.f32 %v2748_v20, %v2718_v52  ;;  %v2651_v14 = vadd.f32 %v3906_v23, %v5259_v12 }
 0x21b   : > { %v3397_v58 = vpack.c.bf16 %v2653_v36, %v2652_v10 }
 0x21c   : > { %v2750_v1 = vadd.f32 %v2749_v13, %v2719_v26  ;;  %v2682_v18 = vadd.f32 %v2681_v9, %v2651_v14  ;;  %v2720_v51 = vmul.f32 %v2651_v14, %v2651_v14  ;;  %v3392_v17 = vpack.c.bf16 %v2651_v14, %v2650_v25 }
 0x21d   : > { %3413 = vst [vmem:[%s5266_s8 + $0x78] sm:$0xff] %v3397_v58  }
 0x21e   : > { %v2683_v22 = vadd.f32 %v2682_v18, %v2652_v10  ;;  %v2751_v12 = vadd.f32 %v2750_v1, %v2720_v51  ;;  %3412 = vst [vmem:[%s5266_s8 + $0x70] sm:$0xff] %v3392_v17  }
 0x21f   : > { %4219 = shalt.err (!%p4216_p5)
}
 0x220   : > { %s4220_s27 = scalar_lea.hbm %s5322_s14, 2048  ;;  %s4224_s8 = scalar_lea.hbm %s5409_s4, 4096 }
 0x221   : > { %p4221_p6 = scmp.ne.s32.totalorder %s5322_s14, %s4220_s27  ;;  %p4225_p10 = scmp.lt.u32.totalorder %s5322_s14, %s5409_s4 }
 0x222   : > { %p4226_p11 = scmp.lt.u32.totalorder %s4224_s8, %s4220_s27  ;;  %p4228_p13 = scmp.lt.u32.totalorder %s4220_s27, %s5322_s14 }
 0x223   : > { %p4222_p7 = pnand %p4221_p6, %p4392_p4 }
 0x224   : > { %p4227_p12 = por %p4226_p11, %p4225_p10 }
 0x225   : > { %p4223_p9 = pneg %p4222_p7 }
 0x226   : > { %p4229_p0 = por %p4228_p13, %p4227_p12 }
 0x228   : > { %p4230_p1 = pnand %p4229_p0, %p4223_p9 }
 0x22a   : > { %4233 = shalt.err (!%p4230_p1)
}
 0x22b   : > { %s4319_s12 = smov 64   ;;  %s4320_s15 = smov 4   ;;  %v2722_v30 = vmul.f32 %v2653_v36, %v2653_v36  ;;  %v2684_v38 = vadd.f32 %v2683_v22, %v2653_v36  ;;  %v2752_v19 = vadd.f32 %v2751_v12, %v2721_v55  ;;  %vm2760_vm4 = vcmask 1040384  }
 0x22c   : > { %4143 = dma.vmem_to_hbm [thread:$0]  (%p4392_p4), %s5324_s10, 2048, %s5322_s14, %s2924_s13, %s4319_s12, %s4319_s12, %s4320_s15  }
 0x22d   : > { %v2685_v24 = vrot.slane %v2684_v38, 4  ;;  %v2753_v7 = vadd.f32 %v2752_v19, %v2722_v30  ;;  %s3097_s16 = sshll.u32 %s5254_s25, 1  ;;  %s3281_s17 = sshll.u32 %s4308_s21, 5 }
 0x22e   : > { %s295_s10 = scalar_lea.vmem [#allocation4], %s3097_s16  ;;  %s5357_s27 = scalar_lea.hbm %s5410_s5, %s3281_s17 }
 0x22f   : > { %v2686_v5 = vadd.f32 %v2685_v24, %v2684_v38  ;;  %v2754_v53 = vrot.slane %v2753_v7, 4  ;;  %s2960_s14 = sshll.u32 %s295_s10, 4  ;;  %s2929_s29 = scalar_lea.sflag [#allocation5], %s5254_s25  ;;  %s5359_s14 = int_to_ptr.vmem [resolvable:$true] %s2960_s14 }
 0x230   : > { %s4234_s7 = scalar_lea.vmem %s5359_s14, 32  ;;  %s4321_s21 = smov [#allocation4]  }
 0x231   : > { %v2687_v49 = vrot.slane %v2686_v5, 2  ;;  %v2755_v54 = vadd.f32 %v2754_v53, %v2753_v7  ;;  %p4235_p2 = scmp.ne.s32.totalorder %s5359_s14, %s4234_s7  ;;  %s4238_s8 = sshll.u32 %s4321_s21, 4  ;;  %s4239_s8 = int_to_ptr.vmem [resolvable:$false] %s4238_s8 }
 0x232   : > { %s4240_s9 = scalar_lea.vmem %s4239_s8, 64  ;;  %p4241_p6 = scmp.lt.s32.totalorder %s5359_s14, %s4239_s8 }
 0x233   : > { %v2688_v61 = vadd.f32 %v2687_v49, %v2686_v5  ;;  %v2756_v11 = vrot.slane %v2755_v54, 2  ;;  %p4236_p3 = pnand %p4235_p2, %p4392_p4  ;;  %p4242_p7 = scmp.lt.s32.totalorder %s4240_s9, %s4234_s7 }
 0x235   : > { %v2689_v28 = vrot.slane %v2688_v61, 1  ;;  %v2757_v37 = vadd.f32 %v2756_v11, %v2755_v54  ;;  %p4237_p5 = pneg %p4236_p3  ;;  %p4243_p9 = por %p4242_p7, %p4241_p6 }
 0x237   : > { %v2758_v15 = vrot.slane %v2757_v37, 1  ;;  %v2690_v60 = vadd.f32 %v2689_v28, %v2688_v61  ;;  %p4244_p10 = pnand %p4243_p9, %p4237_p5 }
 0x239   : > { %v2759_v45 = vadd.f32 %v2758_v15, %v2757_v37 }
 0x23b   : > { %v2761_v41 = vsel %vm2760_vm4, %v2690_v60, %v2759_v45 }
 0x23c   : > { %2762 = vst [vmem:[%s295_s10] sm:$0x3] %v2761_v41 }
 0x23d   : > { %4247 = shalt.err (!%p4244_p10)
}
 0x23e   : > { %s4248_s25 = scalar_lea.hbm %s5357_s27, 32  ;;  %s4252_s15 = scalar_lea.hbm %s5410_s5, 64 }
 0x23f   : > { %p4249_p11 = scmp.ne.s32.totalorder %s5357_s27, %s4248_s25  ;;  %p4253_p0 = scmp.lt.u32.totalorder %s5357_s27, %s5410_s5 }
 0x240   : > { %p4254_p1 = scmp.lt.u32.totalorder %s4252_s15, %s4248_s25  ;;  %p4256_p3 = scmp.lt.u32.totalorder %s4248_s25, %s5357_s27 }
 0x241   : > { %p4250_p12 = pnand %p4249_p11, %p4392_p4 }
 0x242   : > { %p4255_p2 = por %p4254_p1, %p4253_p0 }
 0x243   : > { %p4251_p13 = pneg %p4250_p12 }
 0x244   : > { %p4257_p5 = por %p4256_p3, %p4255_p2 }
 0x246   : > { %p4258_p6 = pnand %p4257_p5, %p4251_p13 }
 0x248   : > { %4261 = shalt.err (!%p4258_p6)
}
 0x249   : > { %4144 = dma.vmem_to_hbm [thread:$0]  (%p4392_p4), %s5359_s14, 32, %s5357_s27, %s2929_s29  }
 0x24a PF: > { %p4155_p7 = scmp.ge.s32.totalorder %s4316_s23, 2  ;;  %s2972_s10 = sand.u32 1, %s4296_s18  }
 0x24b   : > { %s2973_s13 = scalar_lea.sflag [#allocation3], %s2972_s10 }
 0x24c   : > { %p4148_p9 = pnand %p4155_p7, %p4399_p8 }
 0x24e   : > { %4287 = dma.done.wait (!%p4148_p9), %s2973_s13, 2048  }
 0x24f   : > { %4289 = vsyncadd (!%p4148_p9), %s2973_s13, 4294965248  ;;  %s2982_s24 = scalar_lea.sflag [#allocation5], %s2972_s10 }
 0x250   : > { %4291 = dma.done.wait (!%p4148_p9), %s2982_s24, 32  }
 0x251   : > { %4293 = vsyncadd (!%p4148_p9), %s2982_s24, 4294967264  ;;  %s22_s23 = sadd.s32 1, %s4316_s23   ;;  %s5472_s18 = smov %s4300_s19 }
 0x252   : > { %p19_p10 = scmp.ge.s32.totalorder %s22_s23, 4   ;;  %s5473_s19 = smov %s4304_s20 }
 0x253   : > { %s5474_s20 = smov %s4405_s6  ;;  %s5475_s21 = smov %s4312_s22 }
 0x254   : > { %s5476_s22 = smov %s5478_s26  ;;  %21 = sbr.rel (!%p19_p10) target bundleno = 6 (0x6), region = 91 }
 0x25b   :  { %2987 = vsyncpa [#allocation3], 1 }
 0x25c   :  { %2989 = vsyncpa [#allocation3 + $0x1], 1 }
 0x25d   :  { %2990 = vsyncpa [#allocation5], 1 }
 0x25e   :  { %2992 = vsyncpa [#allocation5 + $0x1], 1 }

</bundles_post_ra>
